<compile_context>
chip_gen: v6e
topology: v6e:2x2x1
jax: 0.10.0
libtpu: 0.0.40
codegen_flags: <defaults>
</compile_context>

<pallas_src>
import jax
import jax.numpy as jnp
from jax.experimental import pallas as pl
from jax.experimental.pallas import tpu as pltpu


def _round_up(n, m):
    return ((n + m - 1) // m) * m


def _cdiv(a, b):
    return (a + b - 1) // b


def fused_dnn_kernel(x_ref, *refs):
    """Chained relu?(h @ W_t + b) over all layers for one batch tile.

    refs = (w1, b1, w2, b2, ..., wN, bN, o_ref).  Dots run on the MXU with
    bf16 inputs and an f32 accumulator; bias/ReLU in f32; relu on all but the
    last layer.
    """
    o_ref = refs[-1]
    wb = refs[:-1]
    n_layers = len(wb) // 2

    h = x_ref[...]                                  # bf16 batch tile
    for i in range(n_layers):
        w_ref = wb[2 * i]
        b_ref = wb[2 * i + 1]
        acc = jnp.dot(h, w_ref[...], preferred_element_type=jnp.float32)
        acc = acc + b_ref[...]                      # f32 bias / f32 math
        if i < n_layers - 1:
            acc = jnp.maximum(acc, 0.0)
            h = acc.astype(jnp.bfloat16)            # bf16 back into the MXU
        else:
            h = acc
    o_ref[...] = h.astype(o_ref.dtype)


def prepare_params(params):
    """One-time weight preparation (hoisted out of the per-call forward path).

    params: list of (w_t, b) with w_t (in, out) = transposed torch weight and
    b (out,).  Returns (128-multiple padded) bf16 weights and f32 (1, out_pad)
    biases, ready to be passed to dnn_forward on every call.
    """
    prepared = []
    for w_t, b in params:
        kin, nout = w_t.shape
        kin_pad = _round_up(kin, 128)
        nout_pad = _round_up(nout, 128)
        w_p = jnp.pad(w_t.astype(jnp.bfloat16),
                      ((0, kin_pad - kin), (0, nout_pad - nout)))
        b_p = jnp.pad(b.astype(jnp.float32).reshape(1, -1),
                      ((0, 0), (0, nout_pad - nout)))
        prepared.append((w_p, b_p))
    return prepared


def _vmem_capacity_bytes():
    try:
        return int(pltpu.get_tpu_info().vmem_capacity_bytes)
    except Exception:
        return 64 << 20                             # conservative (v7x) fallback


def _make_call(tm, K_pad, L_pad, grid, prepared, single_buffer_weights):
    """Build the pallas_call for a given tiling / buffering choice."""
    in_specs = [pl.BlockSpec((tm, K_pad), lambda i: (i, 0))]
    for w_p, b_p in prepared:
        if single_buffer_weights:
            # Constant index_map -> never re-fetched across grid steps; single
            # buffering halves resident weight VMEM.
            w_spec = pl.BlockSpec(w_p.shape, lambda i: (0, 0),
                                  pipeline_mode=pl.Buffered(1))
            b_spec = pl.BlockSpec(b_p.shape, lambda i: (0, 0),
                                  pipeline_mode=pl.Buffered(1))
        else:
            w_spec = pl.BlockSpec(w_p.shape, lambda i: (0, 0))
            b_spec = pl.BlockSpec(b_p.shape, lambda i: (0, 0))
        in_specs += [w_spec, b_spec]
    out_specs = pl.BlockSpec((tm, L_pad), lambda i: (i, 0))

    # VMEM guard: weights x1 (single-buffered) or x2, activations x2.
    weight_bytes = sum(w.size * w.dtype.itemsize + b.size * b.dtype.itemsize
                       for w, b in prepared)
    act_bytes = tm * K_pad * 2 + tm * L_pad * 4     # bf16 x tile + f32 out tile
    wt_buffers = 1 if single_buffer_weights else 2
    vmem_need = wt_buffers * weight_bytes + 2 * act_bytes + (4 << 20)
    vmem_budget = max(32 << 20, _vmem_capacity_bytes() - (16 << 20))
    vmem_limit = int(min(vmem_budget, max(32 << 20, vmem_need)))

    M_pad = grid * tm
    return pl.pallas_call(
        fused_dnn_kernel,
        out_shape=jax.ShapeDtypeStruct((M_pad, L_pad), jnp.float32),
        grid_spec=pltpu.PrefetchScalarGridSpec(
            num_scalar_prefetch=0,
            grid=(grid,),
            in_specs=in_specs,
            out_specs=out_specs,
        ),
        compiler_params=pltpu.CompilerParams(
            dimension_semantics=("parallel",),
            vmem_limit_bytes=vmem_limit,
        ),
    )


def dnn_forward(x, prepared_params, out_dim):
    """Fused forward pass.

    x:               (M, K) float array.
    prepared_params: output of prepare_params (padded bf16 weights, f32 biases).
    out_dim:         true (unpadded) output feature count.
    """
    M, K = x.shape
    K_pad = prepared_params[0][0].shape[0]
    L_pad = prepared_params[-1][0].shape[1]
    assert K <= K_pad and out_dim <= L_pad

    # Batch tile: up to 512 rows (multiple of 16 for bf16 sublane packing),
    # sized so padding stays under one tile; force >= 2 programs for larger
    # batches so the "parallel" grid axis can shard across v7x's two TCs.
    cap = 512
    n_tiles = max(1, _cdiv(M, cap))
    if n_tiles < 2 and M >= 256:
        n_tiles = 2
    tm = _round_up(_cdiv(M, n_tiles), 16)
    M_pad = _round_up(M, tm)
    grid = M_pad // tm

    # bf16 x stream: halves the dominant HBM traffic; zero padding is exact.
    x_p = jnp.pad(x.astype(jnp.bfloat16), ((0, M_pad - M), (0, K_pad - K)))

    flat_inputs = [x_p]
    for w_p, b_p in prepared_params:
        flat_inputs += [w_p, b_p]

    try:
        out = _make_call(tm, K_pad, L_pad, grid, prepared_params, True)(*flat_inputs)
    except Exception:
        # Fallback: default double-buffered weight specs (older Pallas API or
        # Buffered(1) rejected by the running lowering).
        out = _make_call(tm, K_pad, L_pad, grid, prepared_params, False)(*flat_inputs)

    return out[:M, :out_dim]


def init_linear(key, in_features, out_features, dtype=jnp.float32):
    """Deterministic init mimicking torch.nn.Linear defaults (uniform +/-1/sqrt(in))."""
    kw, kb = jax.random.split(key)
    bound = 1.0 / jnp.sqrt(jnp.asarray(in_features, dtype))
    # store weight already transposed: (in, out)
    w_t = jax.random.uniform(kw, (in_features, out_features), dtype,
                             minval=-bound, maxval=bound)
    b = jax.random.uniform(kb, (out_features,), dtype,
                           minval=-bound, maxval=bound)
    return w_t, b


if __name__ == "__main__":
    # Small shapes consistent with the module: C=3, L=128 (the module default
    # is L=1025; a smaller L keeps the self-test fast), input dim (2C+1)*L.
    C = 3
    L = 128
    in_dim = (2 * C + 1) * L

    key = jax.random.PRNGKey(0)
    keys = jax.random.split(key, 7)

    params = [init_linear(keys[0], in_dim, L)]
    for i in range(1, 5):
        params.append(init_linear(keys[i], L, L))

    # One-time weight prep (pad + bf16 cast) hoisted out of the forward path.
    prepared = prepare_params(params)

    def reference(x, raw_params):
        # bf16-input / f32-accumulate reference matching the kernel numerics.
        h = x
        for idx, (w_t, b) in enumerate(raw_params):
            h = jnp.dot(h.astype(jnp.bfloat16), w_t.astype(jnp.bfloat16),
                        preferred_element_type=jnp.float32) + b
            if idx < len(raw_params) - 1:
                h = jnp.maximum(h, 0.0)
        return h

    # Exercise both the single-tile (batch=8) and multi-tile (batch=300) paths.
    for batch, xkey in ((8, keys[5]), (300, keys[6])):
        x = jax.random.normal(xkey, (batch, in_dim), dtype=jnp.float32)
        out = jax.block_until_ready(dnn_forward(x, prepared, L))
        ref = reference(x, params)
        assert out.shape == (batch, L)
        assert jnp.allclose(out, ref, rtol=1e-2, atol=1e-2), (
            "max abs err = %f" % float(jnp.max(jnp.abs(out - ref))))

    print("KERNEL_OK")
</pallas_src>

<mosaic_0001>
module attributes {stable_mosaic.version = 11 : i64} {
  func.func @fused_dnn_kernel(%arg0: i32, %arg1: memref<16x896xbf16, #tpu.memory_space<vmem>>, %arg2: memref<896x128xbf16, #tpu.memory_space<vmem>>, %arg3: memref<1x128xf32, #tpu.memory_space<vmem>>, %arg4: memref<128x128xbf16, #tpu.memory_space<vmem>>, %arg5: memref<1x128xf32, #tpu.memory_space<vmem>>, %arg6: memref<128x128xbf16, #tpu.memory_space<vmem>>, %arg7: memref<1x128xf32, #tpu.memory_space<vmem>>, %arg8: memref<128x128xbf16, #tpu.memory_space<vmem>>, %arg9: memref<1x128xf32, #tpu.memory_space<vmem>>, %arg10: memref<128x128xbf16, #tpu.memory_space<vmem>>, %arg11: memref<1x128xf32, #tpu.memory_space<vmem>>, %arg12: memref<16x128xf32, #tpu.memory_space<vmem>>) attributes {dimension_semantics = [#tpu.dimension_semantics<parallel>], iteration_bounds = array<i64: 1>, scalar_prefetch = 0 : i64, scratch_operands = 0 : i64, tpu.core_type = #tpu.core_type<tc>, window_params = [{transform_indices = @transform_0, window_bounds = array<i64: 16, 896>}, {pipeline_mode = #tpu.pipeline_mode<synchronous>, transform_indices = @transform_1, window_bounds = array<i64: 896, 128>}, {pipeline_mode = #tpu.pipeline_mode<synchronous>, transform_indices = @transform_2, window_bounds = array<i64: 1, 128>}, {pipeline_mode = #tpu.pipeline_mode<synchronous>, transform_indices = @transform_3, window_bounds = array<i64: 128, 128>}, {pipeline_mode = #tpu.pipeline_mode<synchronous>, transform_indices = @transform_4, window_bounds = array<i64: 1, 128>}, {pipeline_mode = #tpu.pipeline_mode<synchronous>, transform_indices = @transform_5, window_bounds = array<i64: 128, 128>}, {pipeline_mode = #tpu.pipeline_mode<synchronous>, transform_indices = @transform_6, window_bounds = array<i64: 1, 128>}, {pipeline_mode = #tpu.pipeline_mode<synchronous>, transform_indices = @transform_7, window_bounds = array<i64: 128, 128>}, {pipeline_mode = #tpu.pipeline_mode<synchronous>, transform_indices = @transform_8, window_bounds = array<i64: 1, 128>}, {pipeline_mode = #tpu.pipeline_mode<synchronous>, transform_indices = @transform_9, window_bounds = array<i64: 128, 128>}, {pipeline_mode = #tpu.pipeline_mode<synchronous>, transform_indices = @transform_10, window_bounds = array<i64: 1, 128>}, {transform_indices = @transform_11, window_bounds = array<i64: 16, 128>}]} {
    %c0 = arith.constant 0 : index
    %c0_0 = arith.constant 0 : index
    %0 = vector.load %arg1[%c0, %c0_0] : memref<16x896xbf16, #tpu.memory_space<vmem>>, vector<16x896xbf16>
    %c0_1 = arith.constant 0 : index
    %c0_2 = arith.constant 0 : index
    %1 = vector.load %arg2[%c0_1, %c0_2] : memref<896x128xbf16, #tpu.memory_space<vmem>>, vector<896x128xbf16>
    %cst = arith.constant dense<0.000000e+00> : vector<16x128xf32>
    %2 = tpu.matmul %0, %1, %cst {dimension_numbers = #tpu.dot_dimension_numbers<[1], [0], [0], [1], [0, 0, 1, 1], [], []>} : vector<16x896xbf16>, vector<896x128xbf16>, vector<16x128xf32> -> vector<16x128xf32>
    %c0_3 = arith.constant 0 : index
    %c0_4 = arith.constant 0 : index
    %3 = vector.load %arg3[%c0_3, %c0_4] : memref<1x128xf32, #tpu.memory_space<vmem>>, vector<1x128xf32>
    %4 = vector.broadcast %3 : vector<1x128xf32> to vector<16x128xf32>
    %5 = arith.addf %2, %4 : vector<16x128xf32>
    %cst_5 = arith.constant 0.000000e+00 : f32
    %6 = vector.broadcast %cst_5 : f32 to vector<16x128xf32>
    %7 = arith.maximumf %5, %6 : vector<16x128xf32>
    %8 = arith.truncf %7 : vector<16x128xf32> to vector<16x128xbf16>
    %c0_6 = arith.constant 0 : index
    %c0_7 = arith.constant 0 : index
    %9 = vector.load %arg4[%c0_6, %c0_7] : memref<128x128xbf16, #tpu.memory_space<vmem>>, vector<128x128xbf16>
    %cst_8 = arith.constant dense<0.000000e+00> : vector<16x128xf32>
    %10 = tpu.matmul %8, %9, %cst_8 {dimension_numbers = #tpu.dot_dimension_numbers<[1], [0], [0], [1], [0, 0, 1, 1], [], []>} : vector<16x128xbf16>, vector<128x128xbf16>, vector<16x128xf32> -> vector<16x128xf32>
    %c0_9 = arith.constant 0 : index
    %c0_10 = arith.constant 0 : index
    %11 = vector.load %arg5[%c0_9, %c0_10] : memref<1x128xf32, #tpu.memory_space<vmem>>, vector<1x128xf32>
    %12 = vector.broadcast %11 : vector<1x128xf32> to vector<16x128xf32>
    %13 = arith.addf %10, %12 : vector<16x128xf32>
    %cst_11 = arith.constant 0.000000e+00 : f32
    %14 = vector.broadcast %cst_11 : f32 to vector<16x128xf32>
    %15 = arith.maximumf %13, %14 : vector<16x128xf32>
    %16 = arith.truncf %15 : vector<16x128xf32> to vector<16x128xbf16>
    %c0_12 = arith.constant 0 : index
    %c0_13 = arith.constant 0 : index
    %17 = vector.load %arg6[%c0_12, %c0_13] : memref<128x128xbf16, #tpu.memory_space<vmem>>, vector<128x128xbf16>
    %cst_14 = arith.constant dense<0.000000e+00> : vector<16x128xf32>
    %18 = tpu.matmul %16, %17, %cst_14 {dimension_numbers = #tpu.dot_dimension_numbers<[1], [0], [0], [1], [0, 0, 1, 1], [], []>} : vector<16x128xbf16>, vector<128x128xbf16>, vector<16x128xf32> -> vector<16x128xf32>
    %c0_15 = arith.constant 0 : index
    %c0_16 = arith.constant 0 : index
    %19 = vector.load %arg7[%c0_15, %c0_16] : memref<1x128xf32, #tpu.memory_space<vmem>>, vector<1x128xf32>
    %20 = vector.broadcast %19 : vector<1x128xf32> to vector<16x128xf32>
    %21 = arith.addf %18, %20 : vector<16x128xf32>
    %cst_17 = arith.constant 0.000000e+00 : f32
    %22 = vector.broadcast %cst_17 : f32 to vector<16x128xf32>
    %23 = arith.maximumf %21, %22 : vector<16x128xf32>
    %24 = arith.truncf %23 : vector<16x128xf32> to vector<16x128xbf16>
    %c0_18 = arith.constant 0 : index
    %c0_19 = arith.constant 0 : index
    %25 = vector.load %arg8[%c0_18, %c0_19] : memref<128x128xbf16, #tpu.memory_space<vmem>>, vector<128x128xbf16>
    %cst_20 = arith.constant dense<0.000000e+00> : vector<16x128xf32>
    %26 = tpu.matmul %24, %25, %cst_20 {dimension_numbers = #tpu.dot_dimension_numbers<[1], [0], [0], [1], [0, 0, 1, 1], [], []>} : vector<16x128xbf16>, vector<128x128xbf16>, vector<16x128xf32> -> vector<16x128xf32>
    %c0_21 = arith.constant 0 : index
    %c0_22 = arith.constant 0 : index
    %27 = vector.load %arg9[%c0_21, %c0_22] : memref<1x128xf32, #tpu.memory_space<vmem>>, vector<1x128xf32>
    %28 = vector.broadcast %27 : vector<1x128xf32> to vector<16x128xf32>
    %29 = arith.addf %26, %28 : vector<16x128xf32>
    %cst_23 = arith.constant 0.000000e+00 : f32
    %30 = vector.broadcast %cst_23 : f32 to vector<16x128xf32>
    %31 = arith.maximumf %29, %30 : vector<16x128xf32>
    %32 = arith.truncf %31 : vector<16x128xf32> to vector<16x128xbf16>
    %c0_24 = arith.constant 0 : index
    %c0_25 = arith.constant 0 : index
    %33 = vector.load %arg10[%c0_24, %c0_25] : memref<128x128xbf16, #tpu.memory_space<vmem>>, vector<128x128xbf16>
    %cst_26 = arith.constant dense<0.000000e+00> : vector<16x128xf32>
    %34 = tpu.matmul %32, %33, %cst_26 {dimension_numbers = #tpu.dot_dimension_numbers<[1], [0], [0], [1], [0, 0, 1, 1], [], []>} : vector<16x128xbf16>, vector<128x128xbf16>, vector<16x128xf32> -> vector<16x128xf32>
    %c0_27 = arith.constant 0 : index
    %c0_28 = arith.constant 0 : index
    %35 = vector.load %arg11[%c0_27, %c0_28] : memref<1x128xf32, #tpu.memory_space<vmem>>, vector<1x128xf32>
    %36 = vector.broadcast %35 : vector<1x128xf32> to vector<16x128xf32>
    %37 = arith.addf %34, %36 : vector<16x128xf32>
    %c0_29 = arith.constant 0 : index
    %c0_30 = arith.constant 0 : index
    %38 = vector.load %arg12[%c0_29, %c0_30] : memref<16x128xf32, #tpu.memory_space<vmem>>, vector<16x128xf32>
    tpu.vector_store %arg12[%c0_29, %c0_30], %37 {strides = array<i32>} : memref<16x128xf32, #tpu.memory_space<vmem>>, vector<16x128xf32>,
    return
  }
  func.func @transform_0(%arg0: i32) -> (i32, i32) {
    %c0_i32 = arith.constant 0 : i32
    %c0_i32_0 = arith.constant 0 : i32
    return %arg0, %c0_i32 : i32, i32
  }
  func.func @transform_1(%arg0: i32) -> (i32, i32) {
    %c0_i32 = arith.constant 0 : i32
    %c0_i32_0 = arith.constant 0 : i32
    %c0_i32_1 = arith.constant 0 : i32
    return %c0_i32, %c0_i32_0 : i32, i32
  }
  func.func @transform_2(%arg0: i32) -> (i32, i32) {
    %c0_i32 = arith.constant 0 : i32
    %c0_i32_0 = arith.constant 0 : i32
    %c0_i32_1 = arith.constant 0 : i32
    return %c0_i32, %c0_i32_0 : i32, i32
  }
  func.func @transform_3(%arg0: i32) -> (i32, i32) {
    %c0_i32 = arith.constant 0 : i32
    %c0_i32_0 = arith.constant 0 : i32
    %c0_i32_1 = arith.constant 0 : i32
    return %c0_i32, %c0_i32_0 : i32, i32
  }
  func.func @transform_4(%arg0: i32) -> (i32, i32) {
    %c0_i32 = arith.constant 0 : i32
    %c0_i32_0 = arith.constant 0 : i32
    %c0_i32_1 = arith.constant 0 : i32
    return %c0_i32, %c0_i32_0 : i32, i32
  }
  func.func @transform_5(%arg0: i32) -> (i32, i32) {
    %c0_i32 = arith.constant 0 : i32
    %c0_i32_0 = arith.constant 0 : i32
    %c0_i32_1 = arith.constant 0 : i32
    return %c0_i32, %c0_i32_0 : i32, i32
  }
  func.func @transform_6(%arg0: i32) -> (i32, i32) {
    %c0_i32 = arith.constant 0 : i32
    %c0_i32_0 = arith.constant 0 : i32
    %c0_i32_1 = arith.constant 0 : i32
    return %c0_i32, %c0_i32_0 : i32, i32
  }
  func.func @transform_7(%arg0: i32) -> (i32, i32) {
    %c0_i32 = arith.constant 0 : i32
    %c0_i32_0 = arith.constant 0 : i32
    %c0_i32_1 = arith.constant 0 : i32
    return %c0_i32, %c0_i32_0 : i32, i32
  }
  func.func @transform_8(%arg0: i32) -> (i32, i32) {
    %c0_i32 = arith.constant 0 : i32
    %c0_i32_0 = arith.constant 0 : i32
    %c0_i32_1 = arith.constant 0 : i32
    return %c0_i32, %c0_i32_0 : i32, i32
  }
  func.func @transform_9(%arg0: i32) -> (i32, i32) {
    %c0_i32 = arith.constant 0 : i32
    %c0_i32_0 = arith.constant 0 : i32
    %c0_i32_1 = arith.constant 0 : i32
    return %c0_i32, %c0_i32_0 : i32, i32
  }
  func.func @transform_10(%arg0: i32) -> (i32, i32) {
    %c0_i32 = arith.constant 0 : i32
    %c0_i32_0 = arith.constant 0 : i32
    %c0_i32_1 = arith.constant 0 : i32
    return %c0_i32, %c0_i32_0 : i32, i32
  }
  func.func @transform_11(%arg0: i32) -> (i32, i32) {
    %c0_i32 = arith.constant 0 : i32
    %c0_i32_0 = arith.constant 0 : i32
    return %arg0, %c0_i32 : i32, i32
  }
}

module attributes {stable_mosaic.version = 11 : i64} {
  func.func @fused_dnn_kernel(%arg0: i32, %arg1: memref<16x896xbf16, #tpu.memory_space<vmem>>, %arg2: memref<896x128xbf16, #tpu.memory_space<vmem>>, %arg3: memref<1x128xf32, #tpu.memory_space<vmem>>, %arg4: memref<128x128xbf16, #tpu.memory_space<vmem>>, %arg5: memref<1x128xf32, #tpu.memory_space<vmem>>, %arg6: memref<128x128xbf16, #tpu.memory_space<vmem>>, %arg7: memref<1x128xf32, #tpu.memory_space<vmem>>, %arg8: memref<128x128xbf16, #tpu.memory_space<vmem>>, %arg9: memref<1x128xf32, #tpu.memory_space<vmem>>, %arg10: memref<128x128xbf16, #tpu.memory_space<vmem>>, %arg11: memref<1x128xf32, #tpu.memory_space<vmem>>, %arg12: memref<16x128xf32, #tpu.memory_space<vmem>>) attributes {dimension_semantics = [#tpu.dimension_semantics<parallel>], iteration_bounds = array<i64: 1>, scalar_prefetch = 0 : i64, scratch_operands = 0 : i64, tpu.core_type = #tpu.core_type<tc>, window_params = [{transform_indices = @transform_0, window_bounds = array<i64: 16, 896>}, {pipeline_mode = #tpu.pipeline_mode<synchronous>, transform_indices = @transform_1, window_bounds = array<i64: 896, 128>}, {pipeline_mode = #tpu.pipeline_mode<synchronous>, transform_indices = @transform_2, window_bounds = array<i64: 1, 128>}, {pipeline_mode = #tpu.pipeline_mode<synchronous>, transform_indices = @transform_3, window_bounds = array<i64: 128, 128>}, {pipeline_mode = #tpu.pipeline_mode<synchronous>, transform_indices = @transform_4, window_bounds = array<i64: 1, 128>}, {pipeline_mode = #tpu.pipeline_mode<synchronous>, transform_indices = @transform_5, window_bounds = array<i64: 128, 128>}, {pipeline_mode = #tpu.pipeline_mode<synchronous>, transform_indices = @transform_6, window_bounds = array<i64: 1, 128>}, {pipeline_mode = #tpu.pipeline_mode<synchronous>, transform_indices = @transform_7, window_bounds = array<i64: 128, 128>}, {pipeline_mode = #tpu.pipeline_mode<synchronous>, transform_indices = @transform_8, window_bounds = array<i64: 1, 128>}, {pipeline_mode = #tpu.pipeline_mode<synchronous>, transform_indices = @transform_9, window_bounds = array<i64: 128, 128>}, {pipeline_mode = #tpu.pipeline_mode<synchronous>, transform_indices = @transform_10, window_bounds = array<i64: 1, 128>}, {transform_indices = @transform_11, window_bounds = array<i64: 16, 128>}]} {
    %c0 = arith.constant 0 : index
    %c0_0 = arith.constant 0 : index
    %0 = vector.load %arg1[%c0, %c0_0] : memref<16x896xbf16, #tpu.memory_space<vmem>>, vector<16x896xbf16>
    %c0_1 = arith.constant 0 : index
    %c0_2 = arith.constant 0 : index
    %1 = vector.load %arg2[%c0_1, %c0_2] : memref<896x128xbf16, #tpu.memory_space<vmem>>, vector<896x128xbf16>
    %cst = arith.constant dense<0.000000e+00> : vector<16x128xf32>
    %2 = tpu.matmul %0, %1, %cst {dimension_numbers = #tpu.dot_dimension_numbers<[1], [0], [0], [1], [0, 0, 1, 1], [], []>} : vector<16x896xbf16>, vector<896x128xbf16>, vector<16x128xf32> -> vector<16x128xf32>
    %c0_3 = arith.constant 0 : index
    %c0_4 = arith.constant 0 : index
    %3 = vector.load %arg3[%c0_3, %c0_4] : memref<1x128xf32, #tpu.memory_space<vmem>>, vector<1x128xf32>
    %4 = vector.broadcast %3 : vector<1x128xf32> to vector<16x128xf32>
    %5 = arith.addf %2, %4 : vector<16x128xf32>
    %cst_5 = arith.constant 0.000000e+00 : f32
    %6 = vector.broadcast %cst_5 : f32 to vector<16x128xf32>
    %7 = arith.maximumf %5, %6 : vector<16x128xf32>
    %8 = arith.truncf %7 : vector<16x128xf32> to vector<16x128xbf16>
    %c0_6 = arith.constant 0 : index
    %c0_7 = arith.constant 0 : index
    %9 = vector.load %arg4[%c0_6, %c0_7] : memref<128x128xbf16, #tpu.memory_space<vmem>>, vector<128x128xbf16>
    %cst_8 = arith.constant dense<0.000000e+00> : vector<16x128xf32>
    %10 = tpu.matmul %8, %9, %cst_8 {dimension_numbers = #tpu.dot_dimension_numbers<[1], [0], [0], [1], [0, 0, 1, 1], [], []>} : vector<16x128xbf16>, vector<128x128xbf16>, vector<16x128xf32> -> vector<16x128xf32>
    %c0_9 = arith.constant 0 : index
    %c0_10 = arith.constant 0 : index
    %11 = vector.load %arg5[%c0_9, %c0_10] : memref<1x128xf32, #tpu.memory_space<vmem>>, vector<1x128xf32>
    %12 = vector.broadcast %11 : vector<1x128xf32> to vector<16x128xf32>
    %13 = arith.addf %10, %12 : vector<16x128xf32>
    %cst_11 = arith.constant 0.000000e+00 : f32
    %14 = vector.broadcast %cst_11 : f32 to vector<16x128xf32>
    %15 = arith.maximumf %13, %14 : vector<16x128xf32>
    %16 = arith.truncf %15 : vector<16x128xf32> to vector<16x128xbf16>
    %c0_12 = arith.constant 0 : index
    %c0_13 = arith.constant 0 : index
    %17 = vector.load %arg6[%c0_12, %c0_13] : memref<128x128xbf16, #tpu.memory_space<vmem>>, vector<128x128xbf16>
    %cst_14 = arith.constant dense<0.000000e+00> : vector<16x128xf32>
    %18 = tpu.matmul %16, %17, %cst_14 {dimension_numbers = #tpu.dot_dimension_numbers<[1], [0], [0], [1], [0, 0, 1, 1], [], []>} : vector<16x128xbf16>, vector<128x128xbf16>, vector<16x128xf32> -> vector<16x128xf32>
    %c0_15 = arith.constant 0 : index
    %c0_16 = arith.constant 0 : index
    %19 = vector.load %arg7[%c0_15, %c0_16] : memref<1x128xf32, #tpu.memory_space<vmem>>, vector<1x128xf32>
    %20 = vector.broadcast %19 : vector<1x128xf32> to vector<16x128xf32>
    %21 = arith.addf %18, %20 : vector<16x128xf32>
    %cst_17 = arith.constant 0.000000e+00 : f32
    %22 = vector.broadcast %cst_17 : f32 to vector<16x128xf32>
    %23 = arith.maximumf %21, %22 : vector<16x128xf32>
    %24 = arith.truncf %23 : vector<16x128xf32> to vector<16x128xbf16>
    %c0_18 = arith.constant 0 : index
    %c0_19 = arith.constant 0 : index
    %25 = vector.load %arg8[%c0_18, %c0_19] : memref<128x128xbf16, #tpu.memory_space<vmem>>, vector<128x128xbf16>
    %cst_20 = arith.constant dense<0.000000e+00> : vector<16x128xf32>
    %26 = tpu.matmul %24, %25, %cst_20 {dimension_numbers = #tpu.dot_dimension_numbers<[1], [0], [0], [1], [0, 0, 1, 1], [], []>} : vector<16x128xbf16>, vector<128x128xbf16>, vector<16x128xf32> -> vector<16x128xf32>
    %c0_21 = arith.constant 0 : index
    %c0_22 = arith.constant 0 : index
    %27 = vector.load %arg9[%c0_21, %c0_22] : memref<1x128xf32, #tpu.memory_space<vmem>>, vector<1x128xf32>
    %28 = vector.broadcast %27 : vector<1x128xf32> to vector<16x128xf32>
    %29 = arith.addf %26, %28 : vector<16x128xf32>
    %cst_23 = arith.constant 0.000000e+00 : f32
    %30 = vector.broadcast %cst_23 : f32 to vector<16x128xf32>
    %31 = arith.maximumf %29, %30 : vector<16x128xf32>
    %32 = arith.truncf %31 : vector<16x128xf32> to vector<16x128xbf16>
    %c0_24 = arith.constant 0 : index
    %c0_25 = arith.constant 0 : index
    %33 = vector.load %arg10[%c0_24, %c0_25] : memref<128x128xbf16, #tpu.memory_space<vmem>>, vector<128x128xbf16>
    %cst_26 = arith.constant dense<0.000000e+00> : vector<16x128xf32>
    %34 = tpu.matmul %32, %33, %cst_26 {dimension_numbers = #tpu.dot_dimension_numbers<[1], [0], [0], [1], [0, 0, 1, 1], [], []>} : vector<16x128xbf16>, vector<128x128xbf16>, vector<16x128xf32> -> vector<16x128xf32>
    %c0_27 = arith.constant 0 : index
    %c0_28 = arith.constant 0 : index
    %35 = vector.load %arg11[%c0_27, %c0_28] : memref<1x128xf32, #tpu.memory_space<vmem>>, vector<1x128xf32>
    %36 = vector.broadcast %35 : vector<1x128xf32> to vector<16x128xf32>
    %37 = arith.addf %34, %36 : vector<16x128xf32>
    %c0_29 = arith.constant 0 : index
    %c0_30 = arith.constant 0 : index
    %38 = vector.load %arg12[%c0_29, %c0_30] : memref<16x128xf32, #tpu.memory_space<vmem>>, vector<16x128xf32>
    tpu.vector_store %arg12[%c0_29, %c0_30], %37 {strides = array<i32>} : memref<16x128xf32, #tpu.memory_space<vmem>>, vector<16x128xf32>,
    return
  }
  func.func @transform_0(%arg0: i32) -> (i32, i32) {
    %c0_i32 = arith.constant 0 : i32
    %c0_i32_0 = arith.constant 0 : i32
    return %arg0, %c0_i32 : i32, i32
  }
  func.func @transform_1(%arg0: i32) -> (i32, i32) {
    %c0_i32 = arith.constant 0 : i32
    %c0_i32_0 = arith.constant 0 : i32
    %c0_i32_1 = arith.constant 0 : i32
    return %c0_i32, %c0_i32_0 : i32, i32
  }
  func.func @transform_2(%arg0: i32) -> (i32, i32) {
    %c0_i32 = arith.constant 0 : i32
    %c0_i32_0 = arith.constant 0 : i32
    %c0_i32_1 = arith.constant 0 : i32
    return %c0_i32, %c0_i32_0 : i32, i32
  }
  func.func @transform_3(%arg0: i32) -> (i32, i32) {
    %c0_i32 = arith.constant 0 : i32
    %c0_i32_0 = arith.constant 0 : i32
    %c0_i32_1 = arith.constant 0 : i32
    return %c0_i32, %c0_i32_0 : i32, i32
  }
  func.func @transform_4(%arg0: i32) -> (i32, i32) {
    %c0_i32 = arith.constant 0 : i32
    %c0_i32_0 = arith.constant 0 : i32
    %c0_i32_1 = arith.constant 0 : i32
    return %c0_i32, %c0_i32_0 : i32, i32
  }
  func.func @transform_5(%arg0: i32) -> (i32, i32) {
    %c0_i32 = arith.constant 0 : i32
    %c0_i32_0 = arith.constant 0 : i32
    %c0_i32_1 = arith.constant 0 : i32
    return %c0_i32, %c0_i32_0 : i32, i32
  }
  func.func @transform_6(%arg0: i32) -> (i32, i32) {
    %c0_i32 = arith.constant 0 : i32
    %c0_i32_0 = arith.constant 0 : i32
    %c0_i32_1 = arith.constant 0 : i32
    return %c0_i32, %c0_i32_0 : i32, i32
  }
  func.func @transform_7(%arg0: i32) -> (i32, i32) {
    %c0_i32 = arith.constant 0 : i32
    %c0_i32_0 = arith.constant 0 : i32
    %c0_i32_1 = arith.constant 0 : i32
    return %c0_i32, %c0_i32_0 : i32, i32
  }
  func.func @transform_8(%arg0: i32) -> (i32, i32) {
    %c0_i32 = arith.constant 0 : i32
    %c0_i32_0 = arith.constant 0 : i32
    %c0_i32_1 = arith.constant 0 : i32
    return %c0_i32, %c0_i32_0 : i32, i32
  }
  func.func @transform_9(%arg0: i32) -> (i32, i32) {
    %c0_i32 = arith.constant 0 : i32
    %c0_i32_0 = arith.constant 0 : i32
    %c0_i32_1 = arith.constant 0 : i32
    return %c0_i32, %c0_i32_0 : i32, i32
  }
  func.func @transform_10(%arg0: i32) -> (i32, i32) {
    %c0_i32 = arith.constant 0 : i32
    %c0_i32_0 = arith.constant 0 : i32
    %c0_i32_1 = arith.constant 0 : i32
    return %c0_i32, %c0_i32_0 : i32, i32
  }
  func.func @transform_11(%arg0: i32) -> (i32, i32) {
    %c0_i32 = arith.constant 0 : i32
    %c0_i32_0 = arith.constant 0 : i32
    return %arg0, %c0_i32 : i32, i32
  }
}

</mosaic_0001>

<bundles_post_ra>
// kernel: tpu_custom_call.1
= control target key start
LH: loop header
LB: loop body
LE: loop exit
PB: predicated region body
PF: predicated region fallthrough
CT: control target
= control target key end

     0   :  { %16 = vsyncpa [#allocation3], 0  ;;  %s2017_s0 = inlined_call_operand.hbm [shape: bf16[16,896], index: 0, kind: input, shape index: {}]   ;;  %s2018_s1 = inlined_call_operand.hbm [shape: bf16[896,128], index: 1, kind: input, shape index: {}]   ;;  %s2019_s2 = inlined_call_operand.vmem [shape: f32[1,128], index: 2, kind: input, shape index: {}]   ;;  %s2020_s3 = inlined_call_operand.hbm [shape: bf16[128,128], index: 3, kind: input, shape index: {}]   ;;  %s2021_s4 = inlined_call_operand.vmem [shape: f32[1,128], index: 4, kind: input, shape index: {}]   ;;  %s2022_s5 = inlined_call_operand.hbm [shape: bf16[128,128], index: 5, kind: input, shape index: {}]   ;;  %s2023_s6 = inlined_call_operand.vmem [shape: f32[1,128], index: 6, kind: input, shape index: {}]   ;;  %s2024_s7 = inlined_call_operand.hbm [shape: bf16[128,128], index: 7, kind: input, shape index: {}]   ;;  %s2025_s8 = inlined_call_operand.vmem [shape: f32[1,128], index: 8, kind: input, shape index: {}]   ;;  %s2026_s9 = inlined_call_operand.hbm [shape: bf16[128,128], index: 9, kind: input, shape index: {}]   ;;  %s2027_s10 = inlined_call_operand.vmem [shape: f32[1,128], index: 10, kind: input, shape index: {}]   ;;  %s2028_s11 = inlined_call_operand.hbm [shape: f32[16,128], index: 11, kind: output, shape index: {}]  }
   0x1   :  { %17 = vsyncpa [#allocation6], 0 }
   0x2   :  { %18 = vsyncpa [#allocation9], 0 }
   0x3   :  { %19 = vsyncpa [#allocation12], 0 }
   0x4   :  { %20 = vsyncpa [#allocation4], 0  ;;  %s1841_s17 = smov [#allocation5]  }
   0x5   :  { %s38_s18 = sshll.u32 %s1841_s17, 4  ;;  %s39_s18 = int_to_ptr.vmem [resolvable:$true] %s38_s18 }
   0x6   :  { %s1699_s19 = scalar_lea.vmem %s39_s18, 7168  ;;  %p1704_p1 = scmp.lt.s32.totalorder %s39_s18, %s39_s18 }
   0x7   :  { %p1700_p0 = scmp.ne.s32.totalorder %s39_s18, %s1699_s19  ;;  %p1705_p2 = scmp.lt.s32.totalorder %s1699_s19, %s1699_s19 }
   0x9   :  { %p1706_p3 = por %p1705_p2, %p1704_p1 }
   0xb   :  { %p1707_p4 = pnand %p1706_p3, %p1700_p0 }
   0xd   :  { %1710 = shalt.err (!%p1707_p4)
}
   0xe   :  { %s1842_s20 = smov 64   ;;  %s1843_s21 = smov 4  }
   0xf   :  { %44 = dma.hbm_to_vmem [thread:$0]  %s2018_s1, 7168, %s39_s18, [#allocation6], %s1842_s20, %s1842_s20, %s1843_s21  }
  0x10   :  { %s1844_s24 = smov [#allocation8]   ;;  %s1845_s26 = smov [#allocation2]  }
  0x11   :  { %s66_s25 = sshll.u32 %s1844_s24, 4  ;;  %s26_s27 = sshll.u32 %s1845_s26, 4  ;;  %s67_s25 = int_to_ptr.vmem [resolvable:$true] %s66_s25  ;;  %s27_s27 = int_to_ptr.vmem [resolvable:$true] %s26_s27 }
  0x12   :  { %s1719_s28 = scalar_lea.vmem %s67_s25, 1024  ;;  %p1724_p6 = scmp.lt.s32.totalorder %s67_s25, %s67_s25 }
  0x13   :  { %p1720_p5 = scmp.ne.s32.totalorder %s67_s25, %s1719_s28  ;;  %p1725_p7 = scmp.lt.s32.totalorder %s1719_s28, %s1719_s28 }
  0x15   :  { %p1726_p8 = por %p1725_p7, %p1724_p6 }
  0x17   :  { %p1727_p9 = pnand %p1726_p8, %p1720_p5 }
  0x19   :  { %1730 = shalt.err (!%p1727_p9)
}
  0x1a   :  { %72 = dma.hbm_to_vmem [thread:$0]  %s2022_s5, 1024, %s67_s25, [#allocation9], %s1842_s20, %s1842_s20, %s1843_s21  }
  0x1b   :  { %s1739_s1 = scalar_lea.vmem %s27_s27, 896  ;;  %p1744_p11 = scmp.lt.s32.totalorder %s27_s27, %s27_s27 }
  0x1c   :  { %p1740_p10 = scmp.ne.s32.totalorder %s27_s27, %s1739_s1  ;;  %p1745_p12 = scmp.lt.s32.totalorder %s1739_s1, %s1739_s1 }
  0x1e   :  { %p1746_p13 = por %p1745_p12, %p1744_p11 }
  0x20   :  { %p1747_p0 = pnand %p1746_p13, %p1740_p10 }
  0x22   :  { %1750 = shalt.err (!%p1747_p0)
}
  0x23   :  { %s1846_s12 = smov 448   ;;  %s1847_s13 = smov 28  }
  0x24   :  { %32 = dma.hbm_to_vmem [thread:$0]  %s2017_s0, 896, %s27_s27, [#allocation3], %s1846_s12, %s1846_s12, %s1847_s13  }
  0x25   :  { %s1848_s16 = smov [#allocation7]   ;;  %s1849_s18 = smov [#allocation10]  }
  0x26   :  { %s52_s17 = sshll.u32 %s1848_s16, 4  ;;  %s80_s19 = sshll.u32 %s1849_s18, 4  ;;  %s53_s17 = int_to_ptr.vmem [resolvable:$true] %s52_s17  ;;  %s81_s19 = int_to_ptr.vmem [resolvable:$true] %s80_s19 }
  0x27   :  { %s1759_s5 = scalar_lea.vmem %s53_s17, 1024  ;;  %p1764_p2 = scmp.lt.s32.totalorder %s53_s17, %s53_s17 }
  0x28   :  { %p1760_p1 = scmp.ne.s32.totalorder %s53_s17, %s1759_s5  ;;  %p1765_p3 = scmp.lt.s32.totalorder %s1759_s5, %s1759_s5 }
  0x2a   :  { %p1766_p4 = por %p1765_p3, %p1764_p2 }
  0x2c   :  { %p1767_p5 = pnand %p1766_p4, %p1760_p1 }
  0x2e   :  { %1770 = shalt.err (!%p1767_p5)
}
  0x2f   :  { %58 = dma.hbm_to_vmem [thread:$0]  %s2020_s3, 1024, %s53_s17, [#allocation6], %s1842_s20, %s1842_s20, %s1843_s21  }
  0x30   :  { %s1779_s0 = scalar_lea.vmem %s81_s19, 1024  ;;  %p1784_p7 = scmp.lt.s32.totalorder %s81_s19, %s81_s19 }
  0x31   :  { %p1780_p6 = scmp.ne.s32.totalorder %s81_s19, %s1779_s0  ;;  %p1785_p8 = scmp.lt.s32.totalorder %s1779_s0, %s1779_s0 }
  0x33   :  { %p1786_p9 = por %p1785_p8, %p1784_p7 }
  0x35   :  { %p1787_p10 = pnand %p1786_p9, %p1780_p6 }
  0x37   :  { %1790 = shalt.err (!%p1787_p10)
}
  0x38   :  { %86 = dma.hbm_to_vmem [thread:$0]  %s2024_s7, 1024, %s81_s19, [#allocation9], %s1842_s20, %s1842_s20, %s1843_s21  }
  0x39   :  { %s1850_s26 = smov [#allocation11]  }
  0x3a   :  { %s94_s27 = sshll.u32 %s1850_s26, 4  ;;  %s95_s27 = int_to_ptr.vmem [resolvable:$true] %s94_s27 }
  0x3b   :  { %s1799_s28 = scalar_lea.vmem %s95_s27, 1024  ;;  %p1804_p12 = scmp.lt.s32.totalorder %s95_s27, %s95_s27 }
  0x3c   :  { %p1800_p11 = scmp.ne.s32.totalorder %s95_s27, %s1799_s28  ;;  %p1805_p13 = scmp.lt.s32.totalorder %s1799_s28, %s1799_s28 }
  0x3e   :  { %p1806_p0 = por %p1805_p13, %p1804_p12 }
  0x40   :  { %p1807_p1 = pnand %p1806_p0, %p1800_p11 }
  0x42   :  { %1810 = shalt.err (!%p1807_p1)
}
  0x43   :  { %100 = dma.hbm_to_vmem [thread:$0]  %s2026_s9, 1024, %s95_s27, [#allocation12], %s1842_s20, %s1842_s20, %s1843_s21  }
  0x44   :  { %1831 = dma.done.wait [#allocation3], 896  }
  0x45   :  { %1832 = vsyncadd [#allocation3], 4294966400 }
  0x46   :  { %1833 = dma.done.wait [#allocation6], 8192  }
  0x47   :  { %1834 = vsyncadd [#allocation6], 4294959104 }
  0x48   :  { %1835 = dma.done.wait [#allocation9], 2048  }
  0x49   :  { %1836 = vsyncadd [#allocation9], 4294965248 }
  0x4a   :  { %1837 = dma.done.wait [#allocation12], 1024  }
  0x4b   :  { %1838 = vsyncadd [#allocation12], 4294966272  ;;  %v1593_v0 = vld [vmem:[#allocation5 + $0x78] sm:$0xff]   ;;  %v1597_v4 = vld [vmem:[#allocation5 + $0x70] sm:$0xff]   ;;  %v1851_v36 = vmov 0.0   ;;  %vm1852_vm0 = vmmov 0  }
  0x4c   :  { %v1594_v1 = vld [vmem:[#allocation5 + $0xf8] sm:$0xff]   ;;  %1367 = vmatprep.subr.bf16.mxu0 %v1593_v0  ;;  %v1598_v5 = vld [vmem:[#allocation5 + $0xf0] sm:$0xff]   ;;  %v1601_v8 = vld [vmem:[#allocation5 + $0x68] sm:$0xff]   ;;  %s1853_s13 = smov [#allocation13]  }
  0x4d   :  { %v1595_v2 = vld [vmem:[#allocation5 + $0x38] sm:$0xff]   ;;  %1389 = vmatprep.subr.bf16.mxu1 %v1594_v1  ;;  %v1599_v6 = vld [vmem:[#allocation5 + $0x30] sm:$0xff]   ;;  %v1602_v9 = vld [vmem:[#allocation5 + $0xe8] sm:$0xff]   ;;  %s1252_s14 = sshll.u32 %s1853_s13, 4  ;;  %s1253_s14 = int_to_ptr.vmem [resolvable:$true] %s1252_s14 }
  0x4e   :  { %v1596_v3 = vld [vmem:[#allocation5 + $0xb8] sm:$0xff]   ;;  %1368 = vmatpush3.bf16.msra.mxu0 %v1595_v2  ;;  %v1600_v7 = vld [vmem:[#allocation5 + $0xb0] sm:$0xff]   ;;  %v1603_v10 = vld [vmem:[#allocation5 + $0x28] sm:$0xff]   ;;  %p1816_p3 = scmp.lt.s32.totalorder %s1253_s14, %s1253_s14 }
  0x4f   :  { %1390 = vmatpush3.bf16.msra.mxu1 %v1596_v3  ;;  %1369 = vmatprep.subr.bf16.mxu0 %v1597_v4  ;;  %v1604_v11 = vld [vmem:[#allocation5 + $0xa8] sm:$0xff]   ;;  %v1605_v12 = vld [vmem:[#allocation5 + $0x60] sm:$0xff]   ;;  %v1609_v16 = vld [vmem:[#allocation5 + $0x58] sm:$0xff]  }
  0x50   :  { %1391 = vmatprep.subr.bf16.mxu1 %v1598_v5  ;;  %v1606_v13 = vld [vmem:[#allocation5 + $0xe0] sm:$0xff]   ;;  %v1610_v17 = vld [vmem:[#allocation5 + $0xd8] sm:$0xff]   ;;  %v1613_v20 = vld [vmem:[#allocation5 + $0x50] sm:$0xff]  }
  0x51   :  { %v1607_v14 = vld [vmem:[#allocation5 + $0x20] sm:$0xff]   ;;  %v1611_v18 = vld [vmem:[#allocation5 + $0x18] sm:$0xff]   ;;  %v1614_v21 = vld [vmem:[#allocation5 + $0xd0] sm:$0xff]  }
  0x52   :  { %1370 = vmatpush3.bf16.msra.mxu0 %v1599_v6  ;;  %v1608_v15 = vld [vmem:[#allocation5 + $0xa0] sm:$0xff]   ;;  %v1612_v19 = vld [vmem:[#allocation5 + $0x98] sm:$0xff]   ;;  %v1615_v22 = vld [vmem:[#allocation5 + $0x10] sm:$0xff]  }
  0x53   :  { %1392 = vmatpush3.bf16.msra.mxu1 %v1600_v7  ;;  %1371 = vmatprep.subr.bf16.mxu0 %v1601_v8  ;;  %v1616_v23 = vld [vmem:[#allocation5 + $0x90] sm:$0xff]   ;;  %v1617_v24 = vld [vmem:[#allocation5 + $0x48] sm:$0xff]   ;;  %v1621_v28 = vld [vmem:[#allocation5 + $0x40] sm:$0xff]  }
  0x54   :  { %1393 = vmatprep.subr.bf16.mxu1 %v1602_v9  ;;  %v1618_v25 = vld [vmem:[#allocation5 + $0xc8] sm:$0xff]   ;;  %v1622_v29 = vld [vmem:[#allocation5 + $0xc0] sm:$0xff]   ;;  %v1630_v35 = vld [vmem:[#allocation2 + $0xc] ss:$28 sps:$4 sm:$0xff]  }
  0x55   :  { %v1619_v26 = vld [vmem:[#allocation5 + $0x8] sm:$0xff]   ;;  %v1623_v30 = vld [vmem:[#allocation5] sm:$0xff]   ;;  %v1631_v37 = vld [vmem:[#allocation5 + $0x178] sm:$0xff]   ;;  %694 = vmatprep.mubr.bf16.mxu1 %v1630_v35 }
  0x56   :  { %1372 = vmatpush3.bf16.msra.mxu0 %v1603_v10  ;;  %v1620_v27 = vld [vmem:[#allocation5 + $0x88] sm:$0xff]   ;;  %v1624_v31 = vld [vmem:[#allocation5 + $0x80] sm:$0xff]   ;;  %v1632_v38 = vld [vmem:[#allocation5 + $0x138] sm:$0xff]  }
  0x57   :  { %1394 = vmatpush3.bf16.msra.mxu1 %v1604_v11  ;;  %1373 = vmatprep.subr.bf16.mxu0 %v1605_v12  ;;  %v1625_v32 = vld [vmem:[#allocation2] ss:$28 sps:$4 sm:$0xff]   ;;  %v1628_v34 = vld [vmem:[#allocation2 + $0x8] ss:$28 sps:$4 sm:$0xff]   ;;  %v1633_v39 = vld [vmem:[#allocation5 + $0x1b8] sm:$0xff]  }
  0x58   :  { %1395 = vmatprep.subr.bf16.mxu1 %v1606_v13  ;;  %v1627_v33 = vld [vmem:[#allocation2 + $0x4] ss:$28 sps:$4 sm:$0xff]   ;;  %v1634_v40 = vld [vmem:[#allocation5 + $0x170] sm:$0xff]   ;;  %v1640_v46 = vld [vmem:[#allocation5 + $0x160] sm:$0xff]  }
  0x59   :  { %653 = vmatprep.mubr.bf16.mxu0 %v1627_v33  ;;  %v1635_v41 = vld [vmem:[#allocation5 + $0x130] sm:$0xff]   ;;  %v1637_v43 = vld [vmem:[#allocation5 + $0x168] sm:$0xff]   ;;  %v1641_v47 = vld [vmem:[#allocation5 + $0x120] sm:$0xff]  }
  0x5a   :  { %1374 = vmatpush3.bf16.msra.mxu0 %v1607_v14  ;;  %v1636_v42 = vld [vmem:[#allocation5 + $0x1b0] sm:$0xff]   ;;  %v1638_v44 = vld [vmem:[#allocation5 + $0x128] sm:$0xff]   ;;  %v1642_v48 = vld [vmem:[#allocation5 + $0x1a0] sm:$0xff]  }
  0x5b   :  { %1396 = vmatpush3.bf16.msra.mxu1 %v1608_v15  ;;  %1375 = vmatprep.subr.bf16.mxu0 %v1609_v16  ;;  %v1639_v45 = vld [vmem:[#allocation5 + $0x1a8] sm:$0xff]   ;;  %v1643_v49 = vld [vmem:[#allocation5 + $0x158] sm:$0xff]   ;;  %v1646_v52 = vld [vmem:[#allocation5 + $0x150] sm:$0xff]  }
  0x5c   :  { %1397 = vmatprep.subr.bf16.mxu1 %v1610_v17  ;;  %v1644_v50 = vld [vmem:[#allocation5 + $0x118] sm:$0xff]   ;;  %v1647_v53 = vld [vmem:[#allocation5 + $0x110] sm:$0xff]   ;;  %v1649_v55 = vld [vmem:[#allocation5 + $0x148] sm:$0xff]  }
  0x5d   :  { %v1645_v51 = vld [vmem:[#allocation5 + $0x198] sm:$0xff]   ;;  %v1648_v54 = vld [vmem:[#allocation5 + $0x190] sm:$0xff]   ;;  %v1650_v56 = vld [vmem:[#allocation5 + $0x108] sm:$0xff]  }
  0x5e   :  { %1376 = vmatpush3.bf16.msra.mxu0 %v1611_v18  ;;  %v1651_v57 = vld [vmem:[#allocation5 + $0x188] sm:$0xff]   ;;  %v1652_v58 = vld [vmem:[#allocation5 + $0x140] sm:$0xff]   ;;  %v1657_v59 = vld [vmem:[#allocation2 + $0x14] ss:$28 sps:$4 sm:$0xff]  }
  0x5f   :  { %1398 = vmatpush3.bf16.msra.mxu1 %v1612_v19  ;;  %1377 = vmatprep.subr.bf16.mxu0 %v1613_v20  ;;  %v1653_v60 = vld [vmem:[#allocation5 + $0x100] sm:$0xff]   ;;  %v1655_v62 = vld [vmem:[#allocation2 + $0x10] ss:$28 sps:$4 sm:$0xff]   ;;  %v1661_v2 = vld [vmem:[#allocation7 + $0x28] sm:$0xff]  }
  0x60   :  { %1399 = vmatprep.subr.bf16.mxu1 %v1614_v21  ;;  %v1654_v61 = vld [vmem:[#allocation5 + $0x180] sm:$0xff]   ;;  %v1659_v0 = vld [vmem:[#allocation7 + $0x38] sm:$0xff]   ;;  %v1660_v1 = vld [vmem:[#allocation7 + $0x30] sm:$0xff]  }
  0x61   :  { %v1658_v63 = vld [vmem:[#allocation2 + $0x18] ss:$28 sps:$4 sm:$0xff]   ;;  %v1664_v5 = vld [vmem:[#allocation7 + $0x10] sm:$0xff]   ;;  %v1665_v6 = vld [vmem:[#allocation7 + $0x8] sm:$0xff]  }
  0x62   :  { %1378 = vmatpush3.bf16.msra.mxu0 %v1615_v22  ;;  %v1662_v3 = vld [vmem:[#allocation7 + $0x20] sm:$0xff]   ;;  %v1663_v4 = vld [vmem:[#allocation7 + $0x18] sm:$0xff]   ;;  %v1668_v9 = vld [vmem:[#allocation8 + $0x30] sm:$0xff]  }
  0x63   :  { %1400 = vmatpush3.bf16.msra.mxu1 %v1616_v23  ;;  %1379 = vmatprep.subr.bf16.mxu0 %v1617_v24  ;;  %v1666_v7 = vld [vmem:[#allocation7] sm:$0xff]   ;;  %v1667_v8 = vld [vmem:[#allocation8 + $0x38] sm:$0xff]   ;;  %v1669_v10 = vld [vmem:[#allocation8 + $0x28] sm:$0xff]  }
  0x64   :  { %1401 = vmatprep.subr.bf16.mxu1 %v1618_v25  ;;  %v1670_v11 = vld [vmem:[#allocation8 + $0x20] sm:$0xff]   ;;  %v1671_v12 = vld [vmem:[#allocation8 + $0x18] sm:$0xff]   ;;  %v1267_v20 = vld [vmem:[%s2019_s2] ss:$0 sm:$0xff] }
  0x66   :  { %1380 = vmatpush3.bf16.msra.mxu0 %v1619_v26 }
  0x67   :  { %1402 = vmatpush3.bf16.msra.mxu1 %v1620_v27  ;;  %1381 = vmatprep.subr.bf16.mxu0 %v1621_v28 }
  0x68   :  { %1403 = vmatprep.subr.bf16.mxu1 %v1622_v29 }
  0x6a   :  { %1382 = vmatpush3.bf16.msra.mxu0 %v1623_v30 }
  0x6b   :  { %1404 = vmatpush3.bf16.msra.mxu1 %v1624_v31  ;;  %1411 = vmatprep.subr.bf16.mxu0 %v1631_v37 }
  0x6c   :  { %1478 = vmatprep.subr.bf16.mxu1 %v1851_v36 }
  0x6d   :  { %654 = vmatmul.mubr.bf16.vlgmr.msra.gmra.mxu0 %v1625_v32 }
  0x6e   :  { %695 = vmatmul.mubr.bf16.vlgmr.msra.gmra.mxu1 %v1628_v34  ;;  %1412 = vmatpush3.bf16.msra.mxu0 %v1632_v38 }
  0x6f   :  { %1494 = vmatprep.mubr.msk.bf16.mxu1 %vm1852_vm0, %v1851_v36  ;;  %1479 = vmatpush3.bf16.msra.mxu1 %v1633_v39 }
  0x70   :  { %1413 = vmatprep.subr.bf16.mxu0 %v1634_v40  ;;  %1480 = vmatprep.subr.bf16.mxu1 %v1851_v36 }
  0x71   :  { %735 = vmatprep.mubr.bf16.mxu0 %v1657_v59 }
  0x72   :  { %1414 = vmatpush3.bf16.msra.mxu0 %v1635_v41 }
  0x73   :  { %1481 = vmatpush3.bf16.msra.mxu1 %v1636_v42  ;;  %1415 = vmatprep.subr.bf16.mxu0 %v1637_v43 }
  0x74   :  { %1482 = vmatprep.subr.bf16.mxu1 %v1851_v36 }
  0x76   :  { %1416 = vmatpush3.bf16.msra.mxu0 %v1638_v44 }
  0x77   :  { %1483 = vmatpush3.bf16.msra.mxu1 %v1639_v45  ;;  %1417 = vmatprep.subr.bf16.mxu0 %v1640_v46 }
  0x78   :  { %1484 = vmatprep.subr.bf16.mxu1 %v1851_v36 }
  0x7a   :  { %1418 = vmatpush3.bf16.msra.mxu0 %v1641_v47 }
  0x7b   :  { %1485 = vmatpush3.bf16.msra.mxu1 %v1642_v48  ;;  %1419 = vmatprep.subr.bf16.mxu0 %v1643_v49  ;;  %v1672_v48 = vld [vmem:[#allocation8 + $0x10] sm:$0xff]   ;;  %v1673_v49 = vld [vmem:[#allocation8 + $0x8] sm:$0xff]  }
  0x7c   :  { %1486 = vmatprep.subr.bf16.mxu1 %v1851_v36 }
  0x7e   :  { %1420 = vmatpush3.bf16.msra.mxu0 %v1644_v50  ;;  %v1674_v50 = vld [vmem:[#allocation8] sm:$0xff]  }
  0x7f   :  { %1487 = vmatpush3.bf16.msra.mxu1 %v1645_v51  ;;  %1421 = vmatprep.subr.bf16.mxu0 %v1646_v52  ;;  %v1675_v51 = vld [vmem:[#allocation10 + $0x38] sm:$0xff]   ;;  %v1676_v52 = vld [vmem:[#allocation10 + $0x30] sm:$0xff]  }
  0x80   :  { %1488 = vmatprep.subr.bf16.mxu1 %v1851_v36 }
  0x82   :  { %1422 = vmatpush3.bf16.msra.mxu0 %v1647_v53  ;;  %v1677_v53 = vld [vmem:[#allocation10 + $0x28] sm:$0xff]  }
  0x83   :  { %1489 = vmatpush3.bf16.msra.mxu1 %v1648_v54  ;;  %1423 = vmatprep.subr.bf16.mxu0 %v1649_v55  ;;  %v1678_v54 = vld [vmem:[#allocation10 + $0x20] sm:$0xff]   ;;  %v1679_v55 = vld [vmem:[#allocation10 + $0x18] sm:$0xff]  }
  0x84   :  { %1490 = vmatprep.subr.bf16.mxu1 %v1851_v36 }
  0x86   :  { %1424 = vmatpush3.bf16.msra.mxu0 %v1650_v56  ;;  %v1331_v56 = vld [vmem:[%s2021_s4] ss:$0 sm:$0xff] }
  0x87   :  { %1491 = vmatpush3.bf16.msra.mxu1 %v1651_v57  ;;  %1425 = vmatprep.subr.bf16.mxu0 %v1652_v58 }
  0x88   :  { %1492 = vmatprep.subr.bf16.mxu1 %v1851_v36 }
  0x8a   :  { %1426 = vmatpush3.bf16.msra.mxu0 %v1653_v60 }
  0x8b   :  { %1493 = vmatpush3.bf16.msra.mxu1 %v1654_v61  ;;  %1498 = vmatprep.subr.bf16.mxu0 %v1851_v36 }
  0x8c   :  { %1518 = vmatprep.subr.bf16.mxu1 %v1851_v36 }
  0x8d   :  { %736 = vmatmul.mubr.bf16.vlgmr.msra.gmra.mxu0 %v1655_v62 }
  0x8e   :  { %1495 = vmatmul.mubr.bf16.vlgmr.msra.gmra.mxu1 %v1658_v63  ;;  %1514 = vmatprep.mubr.msk.bf16.mxu0 %vm1852_vm0, %v1851_v36 }
  0x8f   :  { %1534 = vmatprep.mubr.msk.bf16.mxu1 %vm1852_vm0, %v1851_v36  ;;  %1499 = vmatpush3.bf16.msra.mxu0 %v1659_v0 }
  0x90   :  { %1500 = vmatprep.subr.bf16.mxu0 %v1851_v36  ;;  %1519 = vmatpush3.bf16.msra.mxu1 %v1667_v8  ;;  %v1686_v8 = vld [vmem:[#allocation11 + $0x20] sm:$0xff]  }
  0x91   :  { %1520 = vmatprep.subr.bf16.mxu1 %v1851_v36 }
  0x93   :  { %1501 = vmatpush3.bf16.msra.mxu0 %v1660_v1 }
  0x94   :  { %1502 = vmatprep.subr.bf16.mxu0 %v1851_v36  ;;  %1521 = vmatpush3.bf16.msra.mxu1 %v1668_v9  ;;  %v1687_v9 = vld [vmem:[#allocation11 + $0x18] sm:$0xff]  }
  0x95   :  { %1522 = vmatprep.subr.bf16.mxu1 %v1851_v36 }
  0x97   :  { %1503 = vmatpush3.bf16.msra.mxu0 %v1661_v2  ;;  %v1680_v2 = vld [vmem:[#allocation10 + $0x10] sm:$0xff]  }
  0x98   :  { %1504 = vmatprep.subr.bf16.mxu0 %v1851_v36  ;;  %1523 = vmatpush3.bf16.msra.mxu1 %v1669_v10  ;;  %v1340_v10 = vld [vmem:[%s2023_s6] ss:$0 sm:$0xff] }
  0x99   :  { %1524 = vmatprep.subr.bf16.mxu1 %v1851_v36 }
  0x9b   :  { %1505 = vmatpush3.bf16.msra.mxu0 %v1662_v3  ;;  %v1681_v3 = vld [vmem:[#allocation10 + $0x8] sm:$0xff]  }
  0x9c   :  { %1506 = vmatprep.subr.bf16.mxu0 %v1851_v36  ;;  %1525 = vmatpush3.bf16.msra.mxu1 %v1670_v11 }
  0x9d   :  { %1526 = vmatprep.subr.bf16.mxu1 %v1851_v36 }
  0x9f   :  { %1507 = vmatpush3.bf16.msra.mxu0 %v1663_v4  ;;  %v1682_v4 = vld [vmem:[#allocation10] sm:$0xff]  }
  0xa0   :  { %1508 = vmatprep.subr.bf16.mxu0 %v1851_v36  ;;  %1527 = vmatpush3.bf16.msra.mxu1 %v1671_v12 }
  0xa1   :  { %1528 = vmatprep.subr.bf16.mxu1 %v1851_v36 }
  0xa3   :  { %1509 = vmatpush3.bf16.msra.mxu0 %v1664_v5  ;;  %v1683_v5 = vld [vmem:[#allocation11 + $0x38] sm:$0xff]  }
  0xa4   :  { %1510 = vmatprep.subr.bf16.mxu0 %v1851_v36  ;;  %1529 = vmatpush3.bf16.msra.mxu1 %v1672_v48 }
  0xa5   :  { %1530 = vmatprep.subr.bf16.mxu1 %v1851_v36 }
  0xa7   :  { %1511 = vmatpush3.bf16.msra.mxu0 %v1665_v6  ;;  %v1684_v6 = vld [vmem:[#allocation11 + $0x30] sm:$0xff]  }
  0xa8   :  { %1512 = vmatprep.subr.bf16.mxu0 %v1851_v36  ;;  %1531 = vmatpush3.bf16.msra.mxu1 %v1673_v49 }
  0xa9   :  { %1532 = vmatprep.subr.bf16.mxu1 %v1851_v36 }
  0xab   :  { %1513 = vmatpush3.bf16.msra.mxu0 %v1666_v7  ;;  %v1685_v7 = vld [vmem:[#allocation11 + $0x28] sm:$0xff]  }
  0xac   :  { %1538 = vmatprep.subr.bf16.mxu0 %v1851_v36  ;;  %1533 = vmatpush3.bf16.msra.mxu1 %v1674_v50 }
  0xad   :  { %1558 = vmatprep.subr.bf16.mxu1 %v1851_v36 }
 0x12d   :  { %v1383_v13 = vpop.f32.mrf.mxu0 }
 0x12e   :  { %v1405_v14 = vpop.f32.mrf.mxu1 }
 0x12f   :  { %v1384_v15 = vpop.f32.mrf.mxu0 }
 0x130   :  { %v1406_v16 = vpop.f32.mrf.mxu1  ;;  %v1385_v18 = vadd.f32 %v1384_v15, %v1383_v13 }
 0x131   :  { %v1386_v17 = vpop.f32.mrf.mxu0  ;;  %v1407_v23 = vadd.f32 %v1406_v16, %v1405_v14 }
 0x132   :  { %v1408_v19 = vpop.f32.mrf.mxu1  ;;  %v656_v22 = vadd.f32 %v1385_v18, %v1267_v20 }
 0x133   :  { %v1387_v21 = vpop.f32.mrf.mxu0 }
 0x134   :  { %v1388_v24 = vadd.f32 %v1387_v21, %v1386_v17  ;;  %v1409_v25 = vpop.f32.mrf.mxu1  ;;  %v697_v29 = vadd.f32 %v1407_v23, %v656_v22  ;;  %v1689_v21 = vld [vmem:[#allocation11 + $0x8] sm:$0xff]   ;;  %v1690_v22 = vld [vmem:[#allocation11] sm:$0xff]  }
 0x135   :  { %v1410_v31 = vadd.f32 %v1409_v25, %v1408_v19  ;;  %v1349_v23 = vld [vmem:[%s2025_s8] ss:$0 sm:$0xff]  ;;  %s1811_s8 = scalar_lea.vmem %s1253_s14, 256 }
 0x136   :  { %v659_v30 = vadd.f32 %v1388_v24, %v1267_v20  ;;  %v1688_v20 = vld [vmem:[#allocation11 + $0x10] sm:$0xff]   ;;  %p1812_p2 = scmp.ne.s32.totalorder %s1253_s14, %s1811_s8  ;;  %p1817_p4 = scmp.lt.s32.totalorder %s1811_s8, %s1811_s8 }
 0x138   :  { %v700_v39 = vadd.f32 %v1410_v31, %v659_v30  ;;  %p1818_p5 = por %p1817_p4, %p1816_p3 }
 0x13a   :  { %p1819_p6 = pnand %p1818_p5, %p1812_p2 }
 0x14d   :  { %v1427_v26 = vpop.f32.mrf.mxu0 }
 0x14e   :  { %v778_v27 = vpop.f32.mrf.mxu1 }
 0x14f   :  { %v1428_v28 = vpop.f32.mrf.mxu0 }
 0x150   :  { %v1429_v32 = vadd.f32 %v1428_v28, %v1427_v26  ;;  %v1496_v33 = vpop.f32.mrf.mxu1 }
 0x151   :  { %v1430_v34 = vpop.f32.mrf.mxu0 }
 0x152   :  { %v738_v35 = vadd.f32 %v1429_v32, %v697_v29  ;;  %v781_v37 = vpop.f32.mrf.mxu1 }
 0x153   :  { %v1431_v38 = vpop.f32.mrf.mxu0 }
 0x154   :  { %v1432_v40 = vadd.f32 %v1431_v38, %v1430_v34  ;;  %v1497_v41 = vpop.f32.mrf.mxu1  ;;  %v779_v42 = vadd.f32 %v778_v27, %v738_v35 }
 0x156   :  { %v741_v43 = vadd.f32 %v1432_v40, %v700_v39  ;;  %v785_v45 = vmax.f32 %v779_v42, 0.0 }
 0x158   :  { %v782_v44 = vadd.f32 %v781_v37, %v741_v43 }
 0x15a   :  { %v786_v46 = vmax.f32 %v782_v44, 0.0 }
 0x15c   :  { %v787_v47 = vpack.c.bf16 %v786_v46, %v785_v45 }
 0x15e   :  { %1515 = vmatmul.mubr.bf16.vlgmr.msra.gmra.mxu0 %v787_v47 }
 0x15f   :  { %1554 = vmatprep.mubr.msk.bf16.mxu0 %vm1852_vm0, %v1851_v36  ;;  %1539 = vmatpush3.bf16.msra.mxu0 %v1675_v51 }
 0x160   :  { %1540 = vmatprep.subr.bf16.mxu0 %v1851_v36 }
 0x163   :  { %1541 = vmatpush3.bf16.msra.mxu0 %v1676_v52 }
 0x164   :  { %1542 = vmatprep.subr.bf16.mxu0 %v1851_v36 }
 0x167   :  { %1543 = vmatpush3.bf16.msra.mxu0 %v1677_v53 }
 0x168   :  { %1544 = vmatprep.subr.bf16.mxu0 %v1851_v36 }
 0x16b   :  { %1545 = vmatpush3.bf16.msra.mxu0 %v1678_v54 }
 0x16c   :  { %1546 = vmatprep.subr.bf16.mxu0 %v1851_v36 }
 0x16f   :  { %1547 = vmatpush3.bf16.msra.mxu0 %v1679_v55 }
 0x170   :  { %1548 = vmatprep.subr.bf16.mxu0 %v1851_v36 }
 0x173   :  { %1549 = vmatpush3.bf16.msra.mxu0 %v1680_v2 }
 0x174   :  { %1550 = vmatprep.subr.bf16.mxu0 %v1851_v36 }
 0x177   :  { %1551 = vmatpush3.bf16.msra.mxu0 %v1681_v3 }
 0x178   :  { %1552 = vmatprep.subr.bf16.mxu0 %v1851_v36 }
 0x17b   :  { %1553 = vmatpush3.bf16.msra.mxu0 %v1682_v4 }
 0x21e   :  { %v893_v57 = vpop.f32.mrf.mxu0 }
 0x21f   :  { %v894_v59 = vadd.f32 %v1331_v56, %v893_v57 }
 0x220   :  { %v1516_v58 = vpop.f32.mrf.mxu0 }
 0x221   :  { %v900_v63 = vmax.f32 %v894_v59, 0.0 }
 0x222   :  { %v896_v60 = vpop.f32.mrf.mxu0 }
 0x223   :  { %v897_v61 = vadd.f32 %v1331_v56, %v896_v60 }
 0x224   :  { %v1517_v62 = vpop.f32.mrf.mxu0 }
 0x225   :  { %v901_v0 = vmax.f32 %v897_v61, 0.0 }
 0x227   :  { %v902_v1 = vpack.c.bf16 %v901_v0, %v900_v63 }
 0x229   :  { %1535 = vmatmul.mubr.bf16.vlgmr.msra.gmra.mxu1 %v902_v1 }
 0x22a   :  { %1574 = vmatprep.mubr.msk.bf16.mxu1 %vm1852_vm0, %v1851_v36  ;;  %1559 = vmatpush3.bf16.msra.mxu1 %v1683_v5 }
 0x22b   :  { %1560 = vmatprep.subr.bf16.mxu1 %v1851_v36 }
 0x22e   :  { %1561 = vmatpush3.bf16.msra.mxu1 %v1684_v6 }
 0x22f   :  { %1562 = vmatprep.subr.bf16.mxu1 %v1851_v36 }
 0x232   :  { %1563 = vmatpush3.bf16.msra.mxu1 %v1685_v7 }
 0x233   :  { %1564 = vmatprep.subr.bf16.mxu1 %v1851_v36 }
 0x236   :  { %1565 = vmatpush3.bf16.msra.mxu1 %v1686_v8 }
 0x237   :  { %1566 = vmatprep.subr.bf16.mxu1 %v1851_v36 }
 0x23a   :  { %1567 = vmatpush3.bf16.msra.mxu1 %v1687_v9 }
 0x23b   :  { %1568 = vmatprep.subr.bf16.mxu1 %v1851_v36 }
 0x23e   :  { %1569 = vmatpush3.bf16.msra.mxu1 %v1688_v20 }
 0x23f   :  { %1570 = vmatprep.subr.bf16.mxu1 %v1851_v36 }
 0x242   :  { %1571 = vmatpush3.bf16.msra.mxu1 %v1689_v21 }
 0x243   :  { %1572 = vmatprep.subr.bf16.mxu1 %v1851_v36  ;;  %v1358_v36 = vld [vmem:[%s2027_s10] ss:$0 sm:$0xff] }
 0x246   :  { %1573 = vmatpush3.bf16.msra.mxu1 %v1690_v22 }
 0x2e9   :  { %v1008_v11 = vpop.f32.mrf.mxu1 }
 0x2ea   :  { %v1009_v13 = vadd.f32 %v1340_v10, %v1008_v11 }
 0x2eb   :  { %v1536_v12 = vpop.f32.mrf.mxu1 }
 0x2ec   :  { %v1015_v17 = vmax.f32 %v1009_v13, 0.0 }
 0x2ed   :  { %v1011_v14 = vpop.f32.mrf.mxu1 }
 0x2ee   :  { %v1012_v15 = vadd.f32 %v1340_v10, %v1011_v14 }
 0x2ef   :  { %v1537_v16 = vpop.f32.mrf.mxu1 }
 0x2f0   :  { %v1016_v18 = vmax.f32 %v1012_v15, 0.0 }
 0x2f2   :  { %v1017_v19 = vpack.c.bf16 %v1016_v18, %v1015_v17 }
 0x2f4   :  { %1555 = vmatmul.mubr.bf16.vlgmr.msra.gmra.mxu0 %v1017_v19 }
 0x3b4   :  { %v1123_v24 = vpop.f32.mrf.mxu0 }
 0x3b5   :  { %v1124_v26 = vadd.f32 %v1349_v23, %v1123_v24 }
 0x3b6   :  { %v1556_v25 = vpop.f32.mrf.mxu0 }
 0x3b7   :  { %v1130_v30 = vmax.f32 %v1124_v26, 0.0 }
 0x3b8   :  { %v1126_v27 = vpop.f32.mrf.mxu0 }
 0x3b9   :  { %v1127_v28 = vadd.f32 %v1349_v23, %v1126_v27 }
 0x3ba   :  { %v1557_v29 = vpop.f32.mrf.mxu0 }
 0x3bb   :  { %v1131_v31 = vmax.f32 %v1127_v28, 0.0 }
 0x3bd   :  { %v1132_v32 = vpack.c.bf16 %v1131_v31, %v1130_v30 }
 0x3bf   :  { %1575 = vmatmul.mubr.bf16.vlgmr.msra.gmra.mxu1 %v1132_v32 }
 0x47f   :  { %v1238_v33 = vpop.f32.mrf.mxu1 }
 0x480   :  { %v1239_v34 = vadd.f32 %v1358_v36, %v1238_v33 }
 0x481   :  { %v1576_v35 = vpop.f32.mrf.mxu1 }
 0x482   :  { %1245 = vst [vmem:[#allocation13] sm:$0xff] %v1239_v34 }
 0x483   :  { %v1241_v37 = vpop.f32.mrf.mxu1 }
 0x484   :  { %v1242_v38 = vadd.f32 %v1358_v36, %v1241_v37 }
 0x485   :  { %v1577_v39 = vpop.f32.mrf.mxu1 }
 0x486   :  { %1246 = vst [vmem:[#allocation13 + $0x8] sm:$0xff] %v1242_v38 }
 0x487   :  { %1822 = shalt.err (!%p1819_p6)
}
 0x488   :  { %s1854_s15 = smov 128   ;;  %s1855_s10 = smov 8  }
 0x489   :  { %1258 = dma.vmem_to_hbm [thread:$0]  %s1253_s14, 256, %s2028_s11, [#allocation4], %s1854_s15, %s1854_s15, %s1855_s10  }
 0x48a   :  { %1839 = dma.done.wait [#allocation4], 256  }
 0x48b   :  { %1840 = vsyncadd [#allocation4], 4294967040 }
 0x48c   :  { %1262 = vsyncpa [#allocation3], 1 }
 0x48d   :  { %1263 = vsyncpa [#allocation6], 1 }
 0x48e   :  { %1264 = vsyncpa [#allocation9], 1 }
 0x48f   :  { %1265 = vsyncpa [#allocation12], 1 }
 0x490   :  { %1266 = vsyncpa [#allocation4], 1 }

// kernel: tpu_custom_call.1
= control target key start
LH: loop header
LB: loop body
LE: loop exit
PB: predicated region body
PF: predicated region fallthrough
CT: control target
= control target key end

     0   :  { %16 = vsyncpa [#allocation3], 0  ;;  %s2017_s0 = inlined_call_operand.hbm [shape: bf16[16,896], index: 0, kind: input, shape index: {}]   ;;  %s2018_s1 = inlined_call_operand.hbm [shape: bf16[896,128], index: 1, kind: input, shape index: {}]   ;;  %s2019_s2 = inlined_call_operand.vmem [shape: f32[1,128], index: 2, kind: input, shape index: {}]   ;;  %s2020_s3 = inlined_call_operand.hbm [shape: bf16[128,128], index: 3, kind: input, shape index: {}]   ;;  %s2021_s4 = inlined_call_operand.vmem [shape: f32[1,128], index: 4, kind: input, shape index: {}]   ;;  %s2022_s5 = inlined_call_operand.hbm [shape: bf16[128,128], index: 5, kind: input, shape index: {}]   ;;  %s2023_s6 = inlined_call_operand.vmem [shape: f32[1,128], index: 6, kind: input, shape index: {}]   ;;  %s2024_s7 = inlined_call_operand.hbm [shape: bf16[128,128], index: 7, kind: input, shape index: {}]   ;;  %s2025_s8 = inlined_call_operand.vmem [shape: f32[1,128], index: 8, kind: input, shape index: {}]   ;;  %s2026_s9 = inlined_call_operand.hbm [shape: bf16[128,128], index: 9, kind: input, shape index: {}]   ;;  %s2027_s10 = inlined_call_operand.vmem [shape: f32[1,128], index: 10, kind: input, shape index: {}]   ;;  %s2028_s11 = inlined_call_operand.hbm [shape: f32[16,128], index: 11, kind: output, shape index: {}]  }
   0x1   :  { %17 = vsyncpa [#allocation6], 0 }
   0x2   :  { %18 = vsyncpa [#allocation9], 0 }
   0x3   :  { %19 = vsyncpa [#allocation12], 0 }
   0x4   :  { %20 = vsyncpa [#allocation4], 0  ;;  %s1841_s17 = smov [#allocation5]  }
   0x5   :  { %s38_s18 = sshll.u32 %s1841_s17, 4  ;;  %s39_s18 = int_to_ptr.vmem [resolvable:$true] %s38_s18 }
   0x6   :  { %s1699_s19 = scalar_lea.vmem %s39_s18, 7168  ;;  %p1704_p1 = scmp.lt.s32.totalorder %s39_s18, %s39_s18 }
   0x7   :  { %p1700_p0 = scmp.ne.s32.totalorder %s39_s18, %s1699_s19  ;;  %p1705_p2 = scmp.lt.s32.totalorder %s1699_s19, %s1699_s19 }
   0x9   :  { %p1706_p3 = por %p1705_p2, %p1704_p1 }
   0xb   :  { %p1707_p4 = pnand %p1706_p3, %p1700_p0 }
   0xd   :  { %1710 = shalt.err (!%p1707_p4)
}
   0xe   :  { %s1842_s20 = smov 64   ;;  %s1843_s21 = smov 4  }
   0xf   :  { %44 = dma.hbm_to_vmem [thread:$0]  %s2018_s1, 7168, %s39_s18, [#allocation6], %s1842_s20, %s1842_s20, %s1843_s21  }
  0x10   :  { %s1844_s24 = smov [#allocation8]   ;;  %s1845_s26 = smov [#allocation2]  }
  0x11   :  { %s66_s25 = sshll.u32 %s1844_s24, 4  ;;  %s26_s27 = sshll.u32 %s1845_s26, 4  ;;  %s67_s25 = int_to_ptr.vmem [resolvable:$true] %s66_s25  ;;  %s27_s27 = int_to_ptr.vmem [resolvable:$true] %s26_s27 }
  0x12   :  { %s1719_s28 = scalar_lea.vmem %s67_s25, 1024  ;;  %p1724_p6 = scmp.lt.s32.totalorder %s67_s25, %s67_s25 }
  0x13   :  { %p1720_p5 = scmp.ne.s32.totalorder %s67_s25, %s1719_s28  ;;  %p1725_p7 = scmp.lt.s32.totalorder %s1719_s28, %s1719_s28 }
  0x15   :  { %p1726_p8 = por %p1725_p7, %p1724_p6 }
  0x17   :  { %p1727_p9 = pnand %p1726_p8, %p1720_p5 }
  0x19   :  { %1730 = shalt.err (!%p1727_p9)
}
  0x1a   :  { %72 = dma.hbm_to_vmem [thread:$0]  %s2022_s5, 1024, %s67_s25, [#allocation9], %s1842_s20, %s1842_s20, %s1843_s21  }
  0x1b   :  { %s1739_s1 = scalar_lea.vmem %s27_s27, 896  ;;  %p1744_p11 = scmp.lt.s32.totalorder %s27_s27, %s27_s27 }
  0x1c   :  { %p1740_p10 = scmp.ne.s32.totalorder %s27_s27, %s1739_s1  ;;  %p1745_p12 = scmp.lt.s32.totalorder %s1739_s1, %s1739_s1 }
  0x1e   :  { %p1746_p13 = por %p1745_p12, %p1744_p11 }
  0x20   :  { %p1747_p0 = pnand %p1746_p13, %p1740_p10 }
  0x22   :  { %1750 = shalt.err (!%p1747_p0)
}
  0x23   :  { %s1846_s12 = smov 448   ;;  %s1847_s13 = smov 28  }
  0x24   :  { %32 = dma.hbm_to_vmem [thread:$0]  %s2017_s0, 896, %s27_s27, [#allocation3], %s1846_s12, %s1846_s12, %s1847_s13  }
  0x25   :  { %s1848_s16 = smov [#allocation7]   ;;  %s1849_s18 = smov [#allocation10]  }
  0x26   :  { %s52_s17 = sshll.u32 %s1848_s16, 4  ;;  %s80_s19 = sshll.u32 %s1849_s18, 4  ;;  %s53_s17 = int_to_ptr.vmem [resolvable:$true] %s52_s17  ;;  %s81_s19 = int_to_ptr.vmem [resolvable:$true] %s80_s19 }
  0x27   :  { %s1759_s5 = scalar_lea.vmem %s53_s17, 1024  ;;  %p1764_p2 = scmp.lt.s32.totalorder %s53_s17, %s53_s17 }
  0x28   :  { %p1760_p1 = scmp.ne.s32.totalorder %s53_s17, %s1759_s5  ;;  %p1765_p3 = scmp.lt.s32.totalorder %s1759_s5, %s1759_s5 }
  0x2a   :  { %p1766_p4 = por %p1765_p3, %p1764_p2 }
  0x2c   :  { %p1767_p5 = pnand %p1766_p4, %p1760_p1 }
  0x2e   :  { %1770 = shalt.err (!%p1767_p5)
}
  0x2f   :  { %58 = dma.hbm_to_vmem [thread:$0]  %s2020_s3, 1024, %s53_s17, [#allocation6], %s1842_s20, %s1842_s20, %s1843_s21  }
  0x30   :  { %s1779_s0 = scalar_lea.vmem %s81_s19, 1024  ;;  %p1784_p7 = scmp.lt.s32.totalorder %s81_s19, %s81_s19 }
  0x31   :  { %p1780_p6 = scmp.ne.s32.totalorder %s81_s19, %s1779_s0  ;;  %p1785_p8 = scmp.lt.s32.totalorder %s1779_s0, %s1779_s0 }
  0x33   :  { %p1786_p9 = por %p1785_p8, %p1784_p7 }
  0x35   :  { %p1787_p10 = pnand %p1786_p9, %p1780_p6 }
  0x37   :  { %1790 = shalt.err (!%p1787_p10)
}
  0x38   :  { %86 = dma.hbm_to_vmem [thread:$0]  %s2024_s7, 1024, %s81_s19, [#allocation9], %s1842_s20, %s1842_s20, %s1843_s21  }
  0x39   :  { %s1850_s26 = smov [#allocation11]  }
  0x3a   :  { %s94_s27 = sshll.u32 %s1850_s26, 4  ;;  %s95_s27 = int_to_ptr.vmem [resolvable:$true] %s94_s27 }
  0x3b   :  { %s1799_s28 = scalar_lea.vmem %s95_s27, 1024  ;;  %p1804_p12 = scmp.lt.s32.totalorder %s95_s27, %s95_s27 }
  0x3c   :  { %p1800_p11 = scmp.ne.s32.totalorder %s95_s27, %s1799_s28  ;;  %p1805_p13 = scmp.lt.s32.totalorder %s1799_s28, %s1799_s28 }
  0x3e   :  { %p1806_p0 = por %p1805_p13, %p1804_p12 }
  0x40   :  { %p1807_p1 = pnand %p1806_p0, %p1800_p11 }
  0x42   :  { %1810 = shalt.err (!%p1807_p1)
}
  0x43   :  { %100 = dma.hbm_to_vmem [thread:$0]  %s2026_s9, 1024, %s95_s27, [#allocation12], %s1842_s20, %s1842_s20, %s1843_s21  }
  0x44   :  { %1831 = dma.done.wait [#allocation3], 896  }
  0x45   :  { %1832 = vsyncadd [#allocation3], 4294966400 }
  0x46   :  { %1833 = dma.done.wait [#allocation6], 8192  }
  0x47   :  { %1834 = vsyncadd [#allocation6], 4294959104 }
  0x48   :  { %1835 = dma.done.wait [#allocation9], 2048  }
  0x49   :  { %1836 = vsyncadd [#allocation9], 4294965248 }
  0x4a   :  { %1837 = dma.done.wait [#allocation12], 1024  }
  0x4b   :  { %1838 = vsyncadd [#allocation12], 4294966272  ;;  %v1593_v0 = vld [vmem:[#allocation5 + $0x78] sm:$0xff]   ;;  %v1597_v4 = vld [vmem:[#allocation5 + $0x70] sm:$0xff]   ;;  %v1851_v36 = vmov 0.0   ;;  %vm1852_vm0 = vmmov 0  }
  0x4c   :  { %v1594_v1 = vld [vmem:[#allocation5 + $0xf8] sm:$0xff]   ;;  %1367 = vmatprep.subr.bf16.mxu0 %v1593_v0  ;;  %v1598_v5 = vld [vmem:[#allocation5 + $0xf0] sm:$0xff]   ;;  %v1601_v8 = vld [vmem:[#allocation5 + $0x68] sm:$0xff]   ;;  %s1853_s13 = smov [#allocation13]  }
  0x4d   :  { %v1595_v2 = vld [vmem:[#allocation5 + $0x38] sm:$0xff]   ;;  %1389 = vmatprep.subr.bf16.mxu1 %v1594_v1  ;;  %v1599_v6 = vld [vmem:[#allocation5 + $0x30] sm:$0xff]   ;;  %v1602_v9 = vld [vmem:[#allocation5 + $0xe8] sm:$0xff]   ;;  %s1252_s14 = sshll.u32 %s1853_s13, 4  ;;  %s1253_s14 = int_to_ptr.vmem [resolvable:$true] %s1252_s14 }
  0x4e   :  { %v1596_v3 = vld [vmem:[#allocation5 + $0xb8] sm:$0xff]   ;;  %1368 = vmatpush3.bf16.msra.mxu0 %v1595_v2  ;;  %v1600_v7 = vld [vmem:[#allocation5 + $0xb0] sm:$0xff]   ;;  %v1603_v10 = vld [vmem:[#allocation5 + $0x28] sm:$0xff]   ;;  %p1816_p3 = scmp.lt.s32.totalorder %s1253_s14, %s1253_s14 }
  0x4f   :  { %1390 = vmatpush3.bf16.msra.mxu1 %v1596_v3  ;;  %1369 = vmatprep.subr.bf16.mxu0 %v1597_v4  ;;  %v1604_v11 = vld [vmem:[#allocation5 + $0xa8] sm:$0xff]   ;;  %v1605_v12 = vld [vmem:[#allocation5 + $0x60] sm:$0xff]   ;;  %v1609_v16 = vld [vmem:[#allocation5 + $0x58] sm:$0xff]  }
  0x50   :  { %1391 = vmatprep.subr.bf16.mxu1 %v1598_v5  ;;  %v1606_v13 = vld [vmem:[#allocation5 + $0xe0] sm:$0xff]   ;;  %v1610_v17 = vld [vmem:[#allocation5 + $0xd8] sm:$0xff]   ;;  %v1613_v20 = vld [vmem:[#allocation5 + $0x50] sm:$0xff]  }
  0x51   :  { %v1607_v14 = vld [vmem:[#allocation5 + $0x20] sm:$0xff]   ;;  %v1611_v18 = vld [vmem:[#allocation5 + $0x18] sm:$0xff]   ;;  %v1614_v21 = vld [vmem:[#allocation5 + $0xd0] sm:$0xff]  }
  0x52   :  { %1370 = vmatpush3.bf16.msra.mxu0 %v1599_v6  ;;  %v1608_v15 = vld [vmem:[#allocation5 + $0xa0] sm:$0xff]   ;;  %v1612_v19 = vld [vmem:[#allocation5 + $0x98] sm:$0xff]   ;;  %v1615_v22 = vld [vmem:[#allocation5 + $0x10] sm:$0xff]  }
  0x53   :  { %1392 = vmatpush3.bf16.msra.mxu1 %v1600_v7  ;;  %1371 = vmatprep.subr.bf16.mxu0 %v1601_v8  ;;  %v1616_v23 = vld [vmem:[#allocation5 + $0x90] sm:$0xff]   ;;  %v1617_v24 = vld [vmem:[#allocation5 + $0x48] sm:$0xff]   ;;  %v1621_v28 = vld [vmem:[#allocation5 + $0x40] sm:$0xff]  }
  0x54   :  { %1393 = vmatprep.subr.bf16.mxu1 %v1602_v9  ;;  %v1618_v25 = vld [vmem:[#allocation5 + $0xc8] sm:$0xff]   ;;  %v1622_v29 = vld [vmem:[#allocation5 + $0xc0] sm:$0xff]   ;;  %v1630_v35 = vld [vmem:[#allocation2 + $0xc] ss:$28 sps:$4 sm:$0xff]  }
  0x55   :  { %v1619_v26 = vld [vmem:[#allocation5 + $0x8] sm:$0xff]   ;;  %v1623_v30 = vld [vmem:[#allocation5] sm:$0xff]   ;;  %v1631_v37 = vld [vmem:[#allocation5 + $0x178] sm:$0xff]   ;;  %694 = vmatprep.mubr.bf16.mxu1 %v1630_v35 }
  0x56   :  { %1372 = vmatpush3.bf16.msra.mxu0 %v1603_v10  ;;  %v1620_v27 = vld [vmem:[#allocation5 + $0x88] sm:$0xff]   ;;  %v1624_v31 = vld [vmem:[#allocation5 + $0x80] sm:$0xff]   ;;  %v1632_v38 = vld [vmem:[#allocation5 + $0x138] sm:$0xff]  }
  0x57   :  { %1394 = vmatpush3.bf16.msra.mxu1 %v1604_v11  ;;  %1373 = vmatprep.subr.bf16.mxu0 %v1605_v12  ;;  %v1625_v32 = vld [vmem:[#allocation2] ss:$28 sps:$4 sm:$0xff]   ;;  %v1628_v34 = vld [vmem:[#allocation2 + $0x8] ss:$28 sps:$4 sm:$0xff]   ;;  %v1633_v39 = vld [vmem:[#allocation5 + $0x1b8] sm:$0xff]  }
  0x58   :  { %1395 = vmatprep.subr.bf16.mxu1 %v1606_v13  ;;  %v1627_v33 = vld [vmem:[#allocation2 + $0x4] ss:$28 sps:$4 sm:$0xff]   ;;  %v1634_v40 = vld [vmem:[#allocation5 + $0x170] sm:$0xff]   ;;  %v1640_v46 = vld [vmem:[#allocation5 + $0x160] sm:$0xff]  }
  0x59   :  { %653 = vmatprep.mubr.bf16.mxu0 %v1627_v33  ;;  %v1635_v41 = vld [vmem:[#allocation5 + $0x130] sm:$0xff]   ;;  %v1637_v43 = vld [vmem:[#allocation5 + $0x168] sm:$0xff]   ;;  %v1641_v47 = vld [vmem:[#allocation5 + $0x120] sm:$0xff]  }
  0x5a   :  { %1374 = vmatpush3.bf16.msra.mxu0 %v1607_v14  ;;  %v1636_v42 = vld [vmem:[#allocation5 + $0x1b0] sm:$0xff]   ;;  %v1638_v44 = vld [vmem:[#allocation5 + $0x128] sm:$0xff]   ;;  %v1642_v48 = vld [vmem:[#allocation5 + $0x1a0] sm:$0xff]  }
  0x5b   :  { %1396 = vmatpush3.bf16.msra.mxu1 %v1608_v15  ;;  %1375 = vmatprep.subr.bf16.mxu0 %v1609_v16  ;;  %v1639_v45 = vld [vmem:[#allocation5 + $0x1a8] sm:$0xff]   ;;  %v1643_v49 = vld [vmem:[#allocation5 + $0x158] sm:$0xff]   ;;  %v1646_v52 = vld [vmem:[#allocation5 + $0x150] sm:$0xff]  }
  0x5c   :  { %1397 = vmatprep.subr.bf16.mxu1 %v1610_v17  ;;  %v1644_v50 = vld [vmem:[#allocation5 + $0x118] sm:$0xff]   ;;  %v1647_v53 = vld [vmem:[#allocation5 + $0x110] sm:$0xff]   ;;  %v1649_v55 = vld [vmem:[#allocation5 + $0x148] sm:$0xff]  }
  0x5d   :  { %v1645_v51 = vld [vmem:[#allocation5 + $0x198] sm:$0xff]   ;;  %v1648_v54 = vld [vmem:[#allocation5 + $0x190] sm:$0xff]   ;;  %v1650_v56 = vld [vmem:[#allocation5 + $0x108] sm:$0xff]  }
  0x5e   :  { %1376 = vmatpush3.bf16.msra.mxu0 %v1611_v18  ;;  %v1651_v57 = vld [vmem:[#allocation5 + $0x188] sm:$0xff]   ;;  %v1652_v58 = vld [vmem:[#allocation5 + $0x140] sm:$0xff]   ;;  %v1657_v59 = vld [vmem:[#allocation2 + $0x14] ss:$28 sps:$4 sm:$0xff]  }
  0x5f   :  { %1398 = vmatpush3.bf16.msra.mxu1 %v1612_v19  ;;  %1377 = vmatprep.subr.bf16.mxu0 %v1613_v20  ;;  %v1653_v60 = vld [vmem:[#allocation5 + $0x100] sm:$0xff]   ;;  %v1655_v62 = vld [vmem:[#allocation2 + $0x10] ss:$28 sps:$4 sm:$0xff]   ;;  %v1661_v2 = vld [vmem:[#allocation7 + $0x28] sm:$0xff]  }
  0x60   :  { %1399 = vmatprep.subr.bf16.mxu1 %v1614_v21  ;;  %v1654_v61 = vld [vmem:[#allocation5 + $0x180] sm:$0xff]   ;;  %v1659_v0 = vld [vmem:[#allocation7 + $0x38] sm:$0xff]   ;;  %v1660_v1 = vld [vmem:[#allocation7 + $0x30] sm:$0xff]  }
  0x61   :  { %v1658_v63 = vld [vmem:[#allocation2 + $0x18] ss:$28 sps:$4 sm:$0xff]   ;;  %v1664_v5 = vld [vmem:[#allocation7 + $0x10] sm:$0xff]   ;;  %v1665_v6 = vld [vmem:[#allocation7 + $0x8] sm:$0xff]  }
  0x62   :  { %1378 = vmatpush3.bf16.msra.mxu0 %v1615_v22  ;;  %v1662_v3 = vld [vmem:[#allocation7 + $0x20] sm:$0xff]   ;;  %v1663_v4 = vld [vmem:[#allocation7 + $0x18] sm:$0xff]   ;;  %v1668_v9 = vld [vmem:[#allocation8 + $0x30] sm:$0xff]  }
  0x63   :  { %1400 = vmatpush3.bf16.msra.mxu1 %v1616_v23  ;;  %1379 = vmatprep.subr.bf16.mxu0 %v1617_v24  ;;  %v1666_v7 = vld [vmem:[#allocation7] sm:$0xff]   ;;  %v1667_v8 = vld [vmem:[#allocation8 + $0x38] sm:$0xff]   ;;  %v1669_v10 = vld [vmem:[#allocation8 + $0x28] sm:$0xff]  }
  0x64   :  { %1401 = vmatprep.subr.bf16.mxu1 %v1618_v25  ;;  %v1670_v11 = vld [vmem:[#allocation8 + $0x20] sm:$0xff]   ;;  %v1671_v12 = vld [vmem:[#allocation8 + $0x18] sm:$0xff]   ;;  %v1267_v20 = vld [vmem:[%s2019_s2] ss:$0 sm:$0xff] }
  0x66   :  { %1380 = vmatpush3.bf16.msra.mxu0 %v1619_v26 }
  0x67   :  { %1402 = vmatpush3.bf16.msra.mxu1 %v1620_v27  ;;  %1381 = vmatprep.subr.bf16.mxu0 %v1621_v28 }
  0x68   :  { %1403 = vmatprep.subr.bf16.mxu1 %v1622_v29 }
  0x6a   :  { %1382 = vmatpush3.bf16.msra.mxu0 %v1623_v30 }
  0x6b   :  { %1404 = vmatpush3.bf16.msra.mxu1 %v1624_v31  ;;  %1411 = vmatprep.subr.bf16.mxu0 %v1631_v37 }
  0x6c   :  { %1478 = vmatprep.subr.bf16.mxu1 %v1851_v36 }
  0x6d   :  { %654 = vmatmul.mubr.bf16.vlgmr.msra.gmra.mxu0 %v1625_v32 }
  0x6e   :  { %695 = vmatmul.mubr.bf16.vlgmr.msra.gmra.mxu1 %v1628_v34  ;;  %1412 = vmatpush3.bf16.msra.mxu0 %v1632_v38 }
  0x6f   :  { %1494 = vmatprep.mubr.msk.bf16.mxu1 %vm1852_vm0, %v1851_v36  ;;  %1479 = vmatpush3.bf16.msra.mxu1 %v1633_v39 }
  0x70   :  { %1413 = vmatprep.subr.bf16.mxu0 %v1634_v40  ;;  %1480 = vmatprep.subr.bf16.mxu1 %v1851_v36 }
  0x71   :  { %735 = vmatprep.mubr.bf16.mxu0 %v1657_v59 }
  0x72   :  { %1414 = vmatpush3.bf16.msra.mxu0 %v1635_v41 }
  0x73   :  { %1481 = vmatpush3.bf16.msra.mxu1 %v1636_v42  ;;  %1415 = vmatprep.subr.bf16.mxu0 %v1637_v43 }
  0x74   :  { %1482 = vmatprep.subr.bf16.mxu1 %v1851_v36 }
  0x76   :  { %1416 = vmatpush3.bf16.msra.mxu0 %v1638_v44 }
  0x77   :  { %1483 = vmatpush3.bf16.msra.mxu1 %v1639_v45  ;;  %1417 = vmatprep.subr.bf16.mxu0 %v1640_v46 }
  0x78   :  { %1484 = vmatprep.subr.bf16.mxu1 %v1851_v36 }
  0x7a   :  { %1418 = vmatpush3.bf16.msra.mxu0 %v1641_v47 }
  0x7b   :  { %1485 = vmatpush3.bf16.msra.mxu1 %v1642_v48  ;;  %1419 = vmatprep.subr.bf16.mxu0 %v1643_v49  ;;  %v1672_v48 = vld [vmem:[#allocation8 + $0x10] sm:$0xff]   ;;  %v1673_v49 = vld [vmem:[#allocation8 + $0x8] sm:$0xff]  }
  0x7c   :  { %1486 = vmatprep.subr.bf16.mxu1 %v1851_v36 }
  0x7e   :  { %1420 = vmatpush3.bf16.msra.mxu0 %v1644_v50  ;;  %v1674_v50 = vld [vmem:[#allocation8] sm:$0xff]  }
  0x7f   :  { %1487 = vmatpush3.bf16.msra.mxu1 %v1645_v51  ;;  %1421 = vmatprep.subr.bf16.mxu0 %v1646_v52  ;;  %v1675_v51 = vld [vmem:[#allocation10 + $0x38] sm:$0xff]   ;;  %v1676_v52 = vld [vmem:[#allocation10 + $0x30] sm:$0xff]  }
  0x80   :  { %1488 = vmatprep.subr.bf16.mxu1 %v1851_v36 }
  0x82   :  { %1422 = vmatpush3.bf16.msra.mxu0 %v1647_v53  ;;  %v1677_v53 = vld [vmem:[#allocation10 + $0x28] sm:$0xff]  }
  0x83   :  { %1489 = vmatpush3.bf16.msra.mxu1 %v1648_v54  ;;  %1423 = vmatprep.subr.bf16.mxu0 %v1649_v55  ;;  %v1678_v54 = vld [vmem:[#allocation10 + $0x20] sm:$0xff]   ;;  %v1679_v55 = vld [vmem:[#allocation10 + $0x18] sm:$0xff]  }
  0x84   :  { %1490 = vmatprep.subr.bf16.mxu1 %v1851_v36 }
  0x86   :  { %1424 = vmatpush3.bf16.msra.mxu0 %v1650_v56  ;;  %v1331_v56 = vld [vmem:[%s2021_s4] ss:$0 sm:$0xff] }
  0x87   :  { %1491 = vmatpush3.bf16.msra.mxu1 %v1651_v57  ;;  %1425 = vmatprep.subr.bf16.mxu0 %v1652_v58 }
  0x88   :  { %1492 = vmatprep.subr.bf16.mxu1 %v1851_v36 }
  0x8a   :  { %1426 = vmatpush3.bf16.msra.mxu0 %v1653_v60 }
  0x8b   :  { %1493 = vmatpush3.bf16.msra.mxu1 %v1654_v61  ;;  %1498 = vmatprep.subr.bf16.mxu0 %v1851_v36 }
  0x8c   :  { %1518 = vmatprep.subr.bf16.mxu1 %v1851_v36 }
  0x8d   :  { %736 = vmatmul.mubr.bf16.vlgmr.msra.gmra.mxu0 %v1655_v62 }
  0x8e   :  { %1495 = vmatmul.mubr.bf16.vlgmr.msra.gmra.mxu1 %v1658_v63  ;;  %1514 = vmatprep.mubr.msk.bf16.mxu0 %vm1852_vm0, %v1851_v36 }
  0x8f   :  { %1534 = vmatprep.mubr.msk.bf16.mxu1 %vm1852_vm0, %v1851_v36  ;;  %1499 = vmatpush3.bf16.msra.mxu0 %v1659_v0 }
  0x90   :  { %1500 = vmatprep.subr.bf16.mxu0 %v1851_v36  ;;  %1519 = vmatpush3.bf16.msra.mxu1 %v1667_v8  ;;  %v1686_v8 = vld [vmem:[#allocation11 + $0x20] sm:$0xff]  }
  0x91   :  { %1520 = vmatprep.subr.bf16.mxu1 %v1851_v36 }
  0x93   :  { %1501 = vmatpush3.bf16.msra.mxu0 %v1660_v1 }
  0x94   :  { %1502 = vmatprep.subr.bf16.mxu0 %v1851_v36  ;;  %1521 = vmatpush3.bf16.msra.mxu1 %v1668_v9  ;;  %v1687_v9 = vld [vmem:[#allocation11 + $0x18] sm:$0xff]  }
  0x95   :  { %1522 = vmatprep.subr.bf16.mxu1 %v1851_v36 }
  0x97   :  { %1503 = vmatpush3.bf16.msra.mxu0 %v1661_v2  ;;  %v1680_v2 = vld [vmem:[#allocation10 + $0x10] sm:$0xff]  }
  0x98   :  { %1504 = vmatprep.subr.bf16.mxu0 %v1851_v36  ;;  %1523 = vmatpush3.bf16.msra.mxu1 %v1669_v10  ;;  %v1340_v10 = vld [vmem:[%s2023_s6] ss:$0 sm:$0xff] }
  0x99   :  { %1524 = vmatprep.subr.bf16.mxu1 %v1851_v36 }
  0x9b   :  { %1505 = vmatpush3.bf16.msra.mxu0 %v1662_v3  ;;  %v1681_v3 = vld [vmem:[#allocation10 + $0x8] sm:$0xff]  }
  0x9c   :  { %1506 = vmatprep.subr.bf16.mxu0 %v1851_v36  ;;  %1525 = vmatpush3.bf16.msra.mxu1 %v1670_v11 }
  0x9d   :  { %1526 = vmatprep.subr.bf16.mxu1 %v1851_v36 }
  0x9f   :  { %1507 = vmatpush3.bf16.msra.mxu0 %v1663_v4  ;;  %v1682_v4 = vld [vmem:[#allocation10] sm:$0xff]  }
  0xa0   :  { %1508 = vmatprep.subr.bf16.mxu0 %v1851_v36  ;;  %1527 = vmatpush3.bf16.msra.mxu1 %v1671_v12 }
  0xa1   :  { %1528 = vmatprep.subr.bf16.mxu1 %v1851_v36 }
  0xa3   :  { %1509 = vmatpush3.bf16.msra.mxu0 %v1664_v5  ;;  %v1683_v5 = vld [vmem:[#allocation11 + $0x38] sm:$0xff]  }
  0xa4   :  { %1510 = vmatprep.subr.bf16.mxu0 %v1851_v36  ;;  %1529 = vmatpush3.bf16.msra.mxu1 %v1672_v48 }
  0xa5   :  { %1530 = vmatprep.subr.bf16.mxu1 %v1851_v36 }
  0xa7   :  { %1511 = vmatpush3.bf16.msra.mxu0 %v1665_v6  ;;  %v1684_v6 = vld [vmem:[#allocation11 + $0x30] sm:$0xff]  }
  0xa8   :  { %1512 = vmatprep.subr.bf16.mxu0 %v1851_v36  ;;  %1531 = vmatpush3.bf16.msra.mxu1 %v1673_v49 }
  0xa9   :  { %1532 = vmatprep.subr.bf16.mxu1 %v1851_v36 }
  0xab   :  { %1513 = vmatpush3.bf16.msra.mxu0 %v1666_v7  ;;  %v1685_v7 = vld [vmem:[#allocation11 + $0x28] sm:$0xff]  }
  0xac   :  { %1538 = vmatprep.subr.bf16.mxu0 %v1851_v36  ;;  %1533 = vmatpush3.bf16.msra.mxu1 %v1674_v50 }
  0xad   :  { %1558 = vmatprep.subr.bf16.mxu1 %v1851_v36 }
 0x12d   :  { %v1383_v13 = vpop.f32.mrf.mxu0 }
 0x12e   :  { %v1405_v14 = vpop.f32.mrf.mxu1 }
 0x12f   :  { %v1384_v15 = vpop.f32.mrf.mxu0 }
 0x130   :  { %v1406_v16 = vpop.f32.mrf.mxu1  ;;  %v1385_v18 = vadd.f32 %v1384_v15, %v1383_v13 }
 0x131   :  { %v1386_v17 = vpop.f32.mrf.mxu0  ;;  %v1407_v23 = vadd.f32 %v1406_v16, %v1405_v14 }
 0x132   :  { %v1408_v19 = vpop.f32.mrf.mxu1  ;;  %v656_v22 = vadd.f32 %v1385_v18, %v1267_v20 }
 0x133   :  { %v1387_v21 = vpop.f32.mrf.mxu0 }
 0x134   :  { %v1388_v24 = vadd.f32 %v1387_v21, %v1386_v17  ;;  %v1409_v25 = vpop.f32.mrf.mxu1  ;;  %v697_v29 = vadd.f32 %v1407_v23, %v656_v22  ;;  %v1689_v21 = vld [vmem:[#allocation11 + $0x8] sm:$0xff]   ;;  %v1690_v22 = vld [vmem:[#allocation11] sm:$0xff]  }
 0x135   :  { %v1410_v31 = vadd.f32 %v1409_v25, %v1408_v19  ;;  %v1349_v23 = vld [vmem:[%s2025_s8] ss:$0 sm:$0xff]  ;;  %s1811_s8 = scalar_lea.vmem %s1253_s14, 256 }
 0x136   :  { %v659_v30 = vadd.f32 %v1388_v24, %v1267_v20  ;;  %v1688_v20 = vld [vmem:[#allocation11 + $0x10] sm:$0xff]   ;;  %p1812_p2 = scmp.ne.s32.totalorder %s1253_s14, %s1811_s8  ;;  %p1817_p4 = scmp.lt.s32.totalorder %s1811_s8, %s1811_s8 }
 0x138   :  { %v700_v39 = vadd.f32 %v1410_v31, %v659_v30  ;;  %p1818_p5 = por %p1817_p4, %p1816_p3 }
 0x13a   :  { %p1819_p6 = pnand %p1818_p5, %p1812_p2 }
 0x14d   :  { %v1427_v26 = vpop.f32.mrf.mxu0 }
 0x14e   :  { %v778_v27 = vpop.f32.mrf.mxu1 }
 0x14f   :  { %v1428_v28 = vpop.f32.mrf.mxu0 }
 0x150   :  { %v1429_v32 = vadd.f32 %v1428_v28, %v1427_v26  ;;  %v1496_v33 = vpop.f32.mrf.mxu1 }
 0x151   :  { %v1430_v34 = vpop.f32.mrf.mxu0 }
 0x152   :  { %v738_v35 = vadd.f32 %v1429_v32, %v697_v29  ;;  %v781_v37 = vpop.f32.mrf.mxu1 }
 0x153   :  { %v1431_v38 = vpop.f32.mrf.mxu0 }
 0x154   :  { %v1432_v40 = vadd.f32 %v1431_v38, %v1430_v34  ;;  %v1497_v41 = vpop.f32.mrf.mxu1  ;;  %v779_v42 = vadd.f32 %v778_v27, %v738_v35 }
 0x156   :  { %v741_v43 = vadd.f32 %v1432_v40, %v700_v39  ;;  %v785_v45 = vmax.f32 %v779_v42, 0.0 }
 0x158   :  { %v782_v44 = vadd.f32 %v781_v37, %v741_v43 }
 0x15a   :  { %v786_v46 = vmax.f32 %v782_v44, 0.0 }
 0x15c   :  { %v787_v47 = vpack.c.bf16 %v786_v46, %v785_v45 }
 0x15e   :  { %1515 = vmatmul.mubr.bf16.vlgmr.msra.gmra.mxu0 %v787_v47 }
 0x15f   :  { %1554 = vmatprep.mubr.msk.bf16.mxu0 %vm1852_vm0, %v1851_v36  ;;  %1539 = vmatpush3.bf16.msra.mxu0 %v1675_v51 }
 0x160   :  { %1540 = vmatprep.subr.bf16.mxu0 %v1851_v36 }
 0x163   :  { %1541 = vmatpush3.bf16.msra.mxu0 %v1676_v52 }
 0x164   :  { %1542 = vmatprep.subr.bf16.mxu0 %v1851_v36 }
 0x167   :  { %1543 = vmatpush3.bf16.msra.mxu0 %v1677_v53 }
 0x168   :  { %1544 = vmatprep.subr.bf16.mxu0 %v1851_v36 }
 0x16b   :  { %1545 = vmatpush3.bf16.msra.mxu0 %v1678_v54 }
 0x16c   :  { %1546 = vmatprep.subr.bf16.mxu0 %v1851_v36 }
 0x16f   :  { %1547 = vmatpush3.bf16.msra.mxu0 %v1679_v55 }
 0x170   :  { %1548 = vmatprep.subr.bf16.mxu0 %v1851_v36 }
 0x173   :  { %1549 = vmatpush3.bf16.msra.mxu0 %v1680_v2 }
 0x174   :  { %1550 = vmatprep.subr.bf16.mxu0 %v1851_v36 }
 0x177   :  { %1551 = vmatpush3.bf16.msra.mxu0 %v1681_v3 }
 0x178   :  { %1552 = vmatprep.subr.bf16.mxu0 %v1851_v36 }
 0x17b   :  { %1553 = vmatpush3.bf16.msra.mxu0 %v1682_v4 }
 0x21e   :  { %v893_v57 = vpop.f32.mrf.mxu0 }
 0x21f   :  { %v894_v59 = vadd.f32 %v1331_v56, %v893_v57 }
 0x220   :  { %v1516_v58 = vpop.f32.mrf.mxu0 }
 0x221   :  { %v900_v63 = vmax.f32 %v894_v59, 0.0 }
 0x222   :  { %v896_v60 = vpop.f32.mrf.mxu0 }
 0x223   :  { %v897_v61 = vadd.f32 %v1331_v56, %v896_v60 }
 0x224   :  { %v1517_v62 = vpop.f32.mrf.mxu0 }
 0x225   :  { %v901_v0 = vmax.f32 %v897_v61, 0.0 }
 0x227   :  { %v902_v1 = vpack.c.bf16 %v901_v0, %v900_v63 }
 0x229   :  { %1535 = vmatmul.mubr.bf16.vlgmr.msra.gmra.mxu1 %v902_v1 }
 0x22a   :  { %1574 = vmatprep.mubr.msk.bf16.mxu1 %vm1852_vm0, %v1851_v36  ;;  %1559 = vmatpush3.bf16.msra.mxu1 %v1683_v5 }
 0x22b   :  { %1560 = vmatprep.subr.bf16.mxu1 %v1851_v36 }
 0x22e   :  { %1561 = vmatpush3.bf16.msra.mxu1 %v1684_v6 }
 0x22f   :  { %1562 = vmatprep.subr.bf16.mxu1 %v1851_v36 }
 0x232   :  { %1563 = vmatpush3.bf16.msra.mxu1 %v1685_v7 }
 0x233   :  { %1564 = vmatprep.subr.bf16.mxu1 %v1851_v36 }
 0x236   :  { %1565 = vmatpush3.bf16.msra.mxu1 %v1686_v8 }
 0x237   :  { %1566 = vmatprep.subr.bf16.mxu1 %v1851_v36 }
 0x23a   :  { %1567 = vmatpush3.bf16.msra.mxu1 %v1687_v9 }
 0x23b   :  { %1568 = vmatprep.subr.bf16.mxu1 %v1851_v36 }
 0x23e   :  { %1569 = vmatpush3.bf16.msra.mxu1 %v1688_v20 }
 0x23f   :  { %1570 = vmatprep.subr.bf16.mxu1 %v1851_v36 }
 0x242   :  { %1571 = vmatpush3.bf16.msra.mxu1 %v1689_v21 }
 0x243   :  { %1572 = vmatprep.subr.bf16.mxu1 %v1851_v36  ;;  %v1358_v36 = vld [vmem:[%s2027_s10] ss:$0 sm:$0xff] }
 0x246   :  { %1573 = vmatpush3.bf16.msra.mxu1 %v1690_v22 }
 0x2e9   :  { %v1008_v11 = vpop.f32.mrf.mxu1 }
 0x2ea   :  { %v1009_v13 = vadd.f32 %v1340_v10, %v1008_v11 }
 0x2eb   :  { %v1536_v12 = vpop.f32.mrf.mxu1 }
 0x2ec   :  { %v1015_v17 = vmax.f32 %v1009_v13, 0.0 }
 0x2ed   :  { %v1011_v14 = vpop.f32.mrf.mxu1 }
 0x2ee   :  { %v1012_v15 = vadd.f32 %v1340_v10, %v1011_v14 }
 0x2ef   :  { %v1537_v16 = vpop.f32.mrf.mxu1 }
 0x2f0   :  { %v1016_v18 = vmax.f32 %v1012_v15, 0.0 }
 0x2f2   :  { %v1017_v19 = vpack.c.bf16 %v1016_v18, %v1015_v17 }
 0x2f4   :  { %1555 = vmatmul.mubr.bf16.vlgmr.msra.gmra.mxu0 %v1017_v19 }
 0x3b4   :  { %v1123_v24 = vpop.f32.mrf.mxu0 }
 0x3b5   :  { %v1124_v26 = vadd.f32 %v1349_v23, %v1123_v24 }
 0x3b6   :  { %v1556_v25 = vpop.f32.mrf.mxu0 }
 0x3b7   :  { %v1130_v30 = vmax.f32 %v1124_v26, 0.0 }
 0x3b8   :  { %v1126_v27 = vpop.f32.mrf.mxu0 }
 0x3b9   :  { %v1127_v28 = vadd.f32 %v1349_v23, %v1126_v27 }
 0x3ba   :  { %v1557_v29 = vpop.f32.mrf.mxu0 }
 0x3bb   :  { %v1131_v31 = vmax.f32 %v1127_v28, 0.0 }
 0x3bd   :  { %v1132_v32 = vpack.c.bf16 %v1131_v31, %v1130_v30 }
 0x3bf   :  { %1575 = vmatmul.mubr.bf16.vlgmr.msra.gmra.mxu1 %v1132_v32 }
 0x47f   :  { %v1238_v33 = vpop.f32.mrf.mxu1 }
 0x480   :  { %v1239_v34 = vadd.f32 %v1358_v36, %v1238_v33 }
 0x481   :  { %v1576_v35 = vpop.f32.mrf.mxu1 }
 0x482   :  { %1245 = vst [vmem:[#allocation13] sm:$0xff] %v1239_v34 }
 0x483   :  { %v1241_v37 = vpop.f32.mrf.mxu1 }
 0x484   :  { %v1242_v38 = vadd.f32 %v1358_v36, %v1241_v37 }
 0x485   :  { %v1577_v39 = vpop.f32.mrf.mxu1 }
 0x486   :  { %1246 = vst [vmem:[#allocation13 + $0x8] sm:$0xff] %v1242_v38 }
 0x487   :  { %1822 = shalt.err (!%p1819_p6)
}
 0x488   :  { %s1854_s15 = smov 128   ;;  %s1855_s10 = smov 8  }
 0x489   :  { %1258 = dma.vmem_to_hbm [thread:$0]  %s1253_s14, 256, %s2028_s11, [#allocation4], %s1854_s15, %s1854_s15, %s1855_s10  }
 0x48a   :  { %1839 = dma.done.wait [#allocation4], 256  }
 0x48b   :  { %1840 = vsyncadd [#allocation4], 4294967040 }
 0x48c   :  { %1262 = vsyncpa [#allocation3], 1 }
 0x48d   :  { %1263 = vsyncpa [#allocation6], 1 }
 0x48e   :  { %1264 = vsyncpa [#allocation9], 1 }
 0x48f   :  { %1265 = vsyncpa [#allocation12], 1 }
 0x490   :  { %1266 = vsyncpa [#allocation4], 1 }

</bundles_post_ra>
